<compile_context>
chip_gen: v5e
topology: v5e:2x2
jax: 0.10.0
libtpu: 0.0.40
codegen_flags: <defaults>
</compile_context>

<pallas_src>
import functools

import numpy as np
import jax
import jax.numpy as jnp
from jax.experimental import pallas as pl
from jax.experimental.pallas import tpu as pltpu

# Exact f32 matmuls on both the kernel path and the pure-JAX reference so the
# correctness tolerance can be tight (review correctness concern #2).
jax.config.update("jax_default_matmul_precision", "highest")

# ---------------------------- sizes -----------------------------------------
B = 2          # batch
T_WORD = 8     # word-level sequence length (input_word / input_pos / bert_embed)
D_BERT = 32    # all_bert_hidden_dim == bert_hidden_dim (single backbone)
D_WORD = 16    # word embedding dim
D_POS = 8      # pos embedding dim
D_IN = D_WORD + D_POS          # lstm_input_size = 24
D_LSTM = 32                    # lstm_config['dim']
H = D_LSTM // 2                # per-direction hidden = 16
V_WORD = 50
V_POS = 1100

# LSTM weight-slab row layout (all segment starts are multiples of 8 sublanes)
R_WIH = 0                       # rows [0, 48)   : W_ih (both dirs), (2*D_IN, 8H)
R_WHH = 2 * D_IN                # rows [48, 80)  : W_hh block-diagonal, (2H, 8H)
R_BIAS = 2 * D_IN + 2 * H       # row 80         : bias (1, 8H), i/f/o pre-halved
R_SCL = R_BIAS + 8              # row 88         : post-tanh scale (0.5 | 1.0)
R_OFF = R_SCL + 8               # row 96         : post-tanh offset (0.5 | 0.0)
LSTM_SLAB_ROWS = R_OFF + 8      # 104
RED_SLAB_ROWS = 72              # rows [0,64): w_red^T, row 64: b_red


# ------------------------- fused Pallas kernel -------------------------------
def text_encoder_fused_kernel(xa_ref, mask_ref, bert_ref, wl_ref, wr_ref,
                              out_ref, cat_ref, *, T):
    # xa_ref   : (T*Bp, 2*D_IN) row t*Bp+b = [x[t,b,:], x[T-1-t,b,:]]  (time-major)
    # mask_ref : (T*Bp, 2H) f32 row t*Bp+b = [t<len[b]]*H || [(T-1-t)<len[b]]*H
    # bert_ref : (T*Bp, D_BERT) row t*Bp+b (time-major)
    # wl_ref   : (104, 8H) LSTM weight slab (layout above)
    # wr_ref   : (72, D_BERT) reduce_dim slab: rows[0:64]=w_red^T, row 64 = b_red
    # out_ref  : (T*Bp, D_BERT)
    # cat_ref  : (T*Bp, D_BERT + 2H) VMEM scratch, [bert | h_fwd | h_bwd]
    TB = xa_ref.shape[0]
    Bp = TB // T
    DI2 = xa_ref.shape[1]          # 2 * D_IN
    H2 = mask_ref.shape[1]         # 2H = combined [fwd | bwd] state width
    Hh = H2 // 2
    DB = bert_ref.shape[1]

    wih = wl_ref[R_WIH:R_WIH + DI2, :]                 # (2*D_IN, 8H)
    whh = wl_ref[R_WHH:R_WHH + H2, :]                  # (2H, 8H) block-diagonal
    bias = wl_ref[R_BIAS:R_BIAS + 1, :]                # (1, 8H)
    # Post-tanh affine (sigmoid reconstruction) hoisted & pre-broadcast once.
    post_scale = jnp.broadcast_to(wl_ref[R_SCL:R_SCL + 1, :], (Bp, 4 * H2))
    post_off = jnp.broadcast_to(wl_ref[R_OFF:R_OFF + 1, :], (Bp, 4 * H2))

    # Packed-sequence masks: one compare, then static sublane slices in the loop.
    maskb = mask_ref[...] > 0.5                        # (T*Bp, 2H) bool

    # Input projection of BOTH directions in one lane-dense MXU matmul (bias folded
    # in) — entirely off the serial recurrence critical path.
    gx = (jnp.dot(xa_ref[...], wih, preferred_element_type=jnp.float32)
          + bias)                                      # (T*Bp, 8H)

    # [bert | h_fwd | h_bwd] cat buffer for the single merged epilogue matmul.
    cat_ref[:, 0:DB] = bert_ref[...]

    h = jnp.zeros((Bp, H2), jnp.float32)
    c = jnp.zeros((Bp, H2), jnp.float32)

    # Merged fwd/bwd recurrence, statically unrolled (T small & fixed).  At step t
    # the forward half processes position t, the backward half position T-1-t.
    # NOTE: whh is loop-invariant; Mosaic hoists the MXU RHS push out of the
    # unrolled loop.  TODO(synk): explicit pltpu.matmul_push_rhs staging.
    for t in range(T):
        tb = T - 1 - t
        gates = gx[t * Bp:(t + 1) * Bp, :] + jnp.dot(
            h, whh, preferred_element_type=jnp.float32)            # (Bp, 8H)
        # single tanh over all 128 gate lanes: i/f/o pre-activations were halved at
        # weight-prep, so sigmoid(z) == 0.5*tanh(z/2)+0.5; post_scale/post_off
        # restore that affine on the sigmoid lanes and are identity on g lanes.
        act = jnp.tanh(gates) * post_scale + post_off
        # combined gate-column layout: [i_f,i_b | f_f,f_b | o_f,o_b | g_f,g_b]
        i_all = act[:, 0:H2]
        f_all = act[:, H2:2 * H2]
        o_all = act[:, 2 * H2:3 * H2]
        g_all = act[:, 3 * H2:4 * H2]
        c_new = f_all * c + i_all * g_all
        h_new = o_all * jnp.tanh(c_new)

        m = maskb[t * Bp:(t + 1) * Bp, :]                           # (Bp, 2H)
        h = jnp.where(m, h_new, h)
        c = jnp.where(m, c_new, c)
        # Packed-sequence outputs (zero past the length) written straight into the
        # cat buffer; only the epilogue matmul depends on these stores.
        cat_ref[t * Bp:(t + 1) * Bp, DB:DB + Hh] = jnp.where(
            m[:, 0:Hh], h_new[:, 0:Hh], 0.0)                        # fwd out @ pos t
        cat_ref[tb * Bp:(tb + 1) * Bp, DB + Hh:DB + H2] = jnp.where(
            m[:, Hh:H2], h_new[:, Hh:H2], 0.0)                      # bwd out @ pos tb

    # reduce_dim epilogue: cat([bert, lstm], -1) @ W_red.T + b_red as ONE matmul.
    wred = wr_ref[0:DB + H2, :]                                     # (64, D_BERT)
    bred = wr_ref[DB + H2:DB + H2 + 1, :]                           # (1, D_BERT)
    out_ref[...] = (jnp.dot(cat_ref[...], wred,
                            preferred_element_type=jnp.float32) + bred)


# ------------------------- Pallas wrapper ------------------------------------
def text_encoder_fused_pallas(xa2d, mask2h, bert2d, w_lstm_slab, w_red_slab, *, T):
    # Whole working set ~120 KB -> no grid, everything resident in VMEM,
    # default scoped-VMEM limit untouched (per review).
    vmem = pltpu.MemorySpace.VMEM
    TB = xa2d.shape[0]
    kernel = functools.partial(text_encoder_fused_kernel, T=T)
    return pl.pallas_call(
        kernel,
        in_specs=[pl.BlockSpec(memory_space=vmem)] * 5,
        out_specs=pl.BlockSpec(memory_space=vmem),
        out_shape=jax.ShapeDtypeStruct((TB, D_BERT), jnp.float32),
        scratch_shapes=[pltpu.VMEM((TB, D_BERT + D_LSTM), jnp.float32)],
    )(xa2d, mask2h, bert2d, w_lstm_slab, w_red_slab)


# ------------------------- weight preparation --------------------------------
def _combine_lstm_weights(wih_f, whh_f, b_f, wih_b, whh_b, b_b):
    """Build the fused-direction LSTM weights.

    PyTorch per-direction layout: W_ih (4H, D_IN), W_hh (4H, H), bias (4H,),
    gate row order [i, f, g, o].  Combined gate-column order (width H each):
        [i_f, i_b, f_f, f_b, o_f, o_b, g_f, g_b]   (8H = 128 lanes)
    Combined state / xa feature order: [fwd | bwd].
    The i/f/o columns are pre-scaled by 0.5 so the kernel can use a single tanh
    (sigmoid(z) == 0.5*tanh(z/2)+0.5); the matching post-tanh scale/offset rows
    are returned as well.
    """
    def gsplit(w):
        return w[0:H], w[H:2 * H], w[2 * H:3 * H], w[3 * H:4 * H]   # i, f, g, o

    i_f, f_f, g_f, o_f = gsplit(wih_f)          # (H, D_IN)
    i_b, f_b, g_b, o_b = gsplit(wih_b)
    hi_f, hf_f, hg_f, ho_f = gsplit(whh_f)      # (H, H)
    hi_b, hf_b, hg_b, ho_b = gsplit(whh_b)
    bi_f, bf_f, bg_f, bo_f = gsplit(b_f.reshape(4 * H, 1))
    bi_b, bf_b, bg_b, bo_b = gsplit(b_b.reshape(4 * H, 1))

    zi = jnp.zeros_like(i_f)                    # (H, D_IN)
    zh = jnp.zeros_like(hi_f)                   # (H, H)

    wih_fwd = jnp.concatenate([i_f, zi, f_f, zi, o_f, zi, g_f, zi], axis=0)      # (8H, D_IN)
    wih_bwd = jnp.concatenate([zi, i_b, zi, f_b, zi, o_b, zi, g_b], axis=0)      # (8H, D_IN)
    wih_comb = jnp.concatenate([wih_fwd, wih_bwd], axis=1).T                     # (2*D_IN, 8H)

    whh_fwd = jnp.concatenate([hi_f, zh, hf_f, zh, ho_f, zh, hg_f, zh], axis=0)  # (8H, H)
    whh_bwd = jnp.concatenate([zh, hi_b, zh, hf_b, zh, ho_b, zh, hg_b], axis=0)  # (8H, H)
    whh_comb = jnp.concatenate([whh_fwd, whh_bwd], axis=1).T                     # (2H, 8H)

    b_comb = jnp.concatenate(
        [bi_f, bi_b, bf_f, bf_b, bo_f, bo_b, bg_f, bg_b], axis=0).T              # (1, 8H)

    # sigmoid-via-tanh: halve i/f/o pre-activations, keep g untouched.
    n_sig = 6 * H                                                                # 96 lanes
    pre = jnp.concatenate([jnp.full((1, n_sig), 0.5, jnp.float32),
                           jnp.ones((1, 2 * H), jnp.float32)], axis=1)           # (1, 8H)
    wih_comb = wih_comb * pre
    whh_comb = whh_comb * pre
    b_comb = b_comb * pre
    post_scale = pre                                                             # 0.5 | 1.0
    post_off = jnp.concatenate([jnp.full((1, n_sig), 0.5, jnp.float32),
                                jnp.zeros((1, 2 * H), jnp.float32)], axis=1)     # 0.5 | 0.0
    return wih_comb, whh_comb, b_comb, post_scale, post_off


def init_params(key):
    ks = jax.random.split(key, 12)
    std = 0.02
    word_emb = jax.random.normal(ks[0], (V_WORD, D_WORD), jnp.float32) * std
    pos_emb = jax.random.normal(ks[1], (V_POS, D_POS), jnp.float32) * std
    pos_emb = pos_emb.at[0].set(0.0)            # padding_idx = 0 zeroed at init

    klstm = 1.0 / np.sqrt(H)

    def unif(kk, shape, bound):
        return jax.random.uniform(kk, shape, jnp.float32, -bound, bound)

    wih_f = unif(ks[2], (4 * H, D_IN), klstm)
    whh_f = unif(ks[3], (4 * H, H), klstm)
    b_f = unif(ks[4], (4 * H,), klstm) + unif(ks[5], (4 * H,), klstm)   # b_ih + b_hh
    wih_b = unif(ks[6], (4 * H, D_IN), klstm)
    whh_b = unif(ks[7], (4 * H, H), klstm)
    b_b = unif(ks[8], (4 * H,), klstm) + unif(ks[9], (4 * H,), klstm)

    kred = 1.0 / np.sqrt(D_BERT + D_LSTM)
    w_red = unif(ks[10], (D_BERT, D_BERT + D_LSTM), kred)    # (out, in) as nn.Linear
    b_red = unif(ks[11], (D_BERT,), kred)

    wih_comb, whh_comb, b_comb, post_scale, post_off = _combine_lstm_weights(
        wih_f, whh_f, b_f, wih_b, whh_b, b_b)

    # --- LSTM weight slab (104, 128): all constant recurrence operands in one DMA
    w_lstm_slab = jnp.zeros((LSTM_SLAB_ROWS, 8 * H), jnp.float32)
    w_lstm_slab = w_lstm_slab.at[R_WIH:R_WIH + 2 * D_IN, :].set(wih_comb)
    w_lstm_slab = w_lstm_slab.at[R_WHH:R_WHH + 2 * H, :].set(whh_comb)
    w_lstm_slab = w_lstm_slab.at[R_BIAS, :].set(b_comb[0])
    w_lstm_slab = w_lstm_slab.at[R_SCL, :].set(post_scale[0])
    w_lstm_slab = w_lstm_slab.at[R_OFF, :].set(post_off[0])

    # --- reduce_dim slab (72, 32): w_red^T (cat order [bert | h_fwd | h_bwd]) + bias
    w_red_slab = jnp.zeros((RED_SLAB_ROWS, D_BERT), jnp.float32)
    w_red_slab = w_red_slab.at[0:D_BERT + D_LSTM, :].set(w_red.T)
    w_red_slab = w_red_slab.at[D_BERT + D_LSTM, :].set(b_red)

    return dict(
        word_emb=word_emb, pos_emb=pos_emb,
        # per-direction weights (pure-JAX reference path)
        wih_f_T=wih_f.T, whh_f_T=whh_f.T, b_f=b_f,
        wih_b_T=wih_b.T, whh_b_T=whh_b.T, b_b=b_b,
        w_red=w_red, b_red=b_red,
        # fused-kernel slabs
        w_lstm_slab=w_lstm_slab, w_red_slab=w_red_slab,
    )


# ------------------------- forward (TextEncoder.forward) ---------------------
def text_encoder_forward(params, bert_embed, input_word, input_pos):
    """jit-able forward.  Returns the full (B, T, D_BERT) tensor plus embeds_length;
    the caller takes the ragged [:, :max(embeds_length)] view (no host sync here)."""
    Bb, T = input_word.shape

    # embeds_length = (input_word != max(input_word)).sum(1)
    pad_id = jnp.max(input_word)
    embeds_length = jnp.sum(input_word != pad_id, axis=1).astype(jnp.int32)
    lstm_lengths = jnp.maximum(embeds_length, 1)     # pack_padded clamps 0 -> 1

    # get_bert_hidden: bert_embed is not None -> returned as-is.
    # get_pos_word_char (dropouts are identities); embeds = [pos_embed, word_embed]
    x = jnp.concatenate([params['pos_emb'][input_pos],
                         params['word_emb'][input_word]], axis=-1)   # (B, T, D_IN)

    # Pad batch to a multiple of 8: fills every vreg sublane / MXU row and keeps all
    # per-step scratch stores sublane-aligned.  Pad rows get length 0 -> masked out.
    Bp = ((Bb + 7) // 8) * 8
    pad = Bp - Bb
    x_p = jnp.pad(x, ((0, pad), (0, 0), (0, 0)))
    bert_p = jnp.pad(bert_embed, ((0, pad), (0, 0), (0, 0)))
    len_p = jnp.pad(lstm_lengths, (0, pad))

    # Time-major rows (row = t*Bp + b); xa pairs x[t] with x[T-1-t] so one MXU
    # matmul covers the input projection of both LSTM directions.
    x_tm = jnp.transpose(x_p, (1, 0, 2))                              # (T, Bp, D_IN)
    xa2d = jnp.concatenate([x_tm, x_tm[::-1]], axis=-1).reshape(T * Bp, 2 * D_IN)
    bert2d = jnp.transpose(bert_p, (1, 0, 2)).reshape(T * Bp, D_BERT)

    # Packed-sequence masks precomputed once: fwd half t<len, bwd half (T-1-t)<len.
    t_idx = jnp.arange(T, dtype=jnp.int32)[:, None]                   # (T, 1)
    mf = (t_idx < len_p[None, :]).astype(jnp.float32)                 # (T, Bp)
    mb = ((T - 1 - t_idx) < len_p[None, :]).astype(jnp.float32)
    mask2h = jnp.concatenate(
        [jnp.broadcast_to(mf[:, :, None], (T, Bp, H)),
         jnp.broadcast_to(mb[:, :, None], (T, Bp, H))],
        axis=-1).reshape(T * Bp, 2 * H)

    out2d = text_encoder_fused_pallas(
        xa2d, mask2h, bert2d, params['w_lstm_slab'], params['w_red_slab'], T=T)

    out = jnp.transpose(out2d.reshape(T, Bp, D_BERT), (1, 0, 2))[:Bb]  # (B, T, D_BERT)
    return out, embeds_length


# ------------------------- pure-JAX reference --------------------------------
def reference_forward(params, bert_embed, input_word, input_pos):
    pad_id = jnp.max(input_word)
    lengths = jnp.sum(input_word != pad_id, axis=1).astype(jnp.int32)
    lmax = int(jnp.max(lengths))          # reference is a host-side oracle (not jitted)
    lstm_lengths = jnp.maximum(lengths, 1)
    x = jnp.concatenate([params['pos_emb'][input_pos],
                         params['word_emb'][input_word]], axis=-1)
    Bb, T, _ = x.shape

    def run(reverse, wih_T, whh_T, b):
        h = jnp.zeros((Bb, H), jnp.float32)
        c = jnp.zeros((Bb, H), jnp.float32)
        outs = [None] * T
        order = range(T - 1, -1, -1) if reverse else range(T)
        for t in order:
            gates = x[:, t] @ wih_T + h @ whh_T + b
            i = jax.nn.sigmoid(gates[:, :H])
            f = jax.nn.sigmoid(gates[:, H:2 * H])
            g = jnp.tanh(gates[:, 2 * H:3 * H])
            o = jax.nn.sigmoid(gates[:, 3 * H:])
            c_new = f * c + i * g
            h_new = o * jnp.tanh(c_new)
            mask = (t < lstm_lengths)[:, None]
            h = jnp.where(mask, h_new, h)
            c = jnp.where(mask, c_new, c)
            outs[t] = jnp.where(mask, h_new, 0.0)
        return jnp.stack(outs, axis=1)

    hf = run(False, params['wih_f_T'], params['whh_f_T'], params['b_f'])
    hb = run(True, params['wih_b_T'], params['whh_b_T'], params['b_b'])
    lstm_out = jnp.concatenate([hf, hb], axis=-1)[:, :lmax]
    cat = jnp.concatenate([bert_embed[:, :lmax], lstm_out], axis=-1)
    return cat @ params['w_red'].T + params['b_red']


# ------------------------- main ----------------------------------------------
if __name__ == "__main__":
    key = jax.random.PRNGKey(0)
    pkey, dkey = jax.random.split(key)
    params = init_params(pkey)
    k1, k2 = jax.random.split(dkey)

    # padding token of input_word is its global max (49); lengths = [6, 5]
    input_word = jnp.asarray(np.array(
        [[3, 7, 11, 23, 30, 8, 49, 49],
         [5, 12, 40, 2, 17, 49, 49, 49]], dtype=np.int32))
    input_pos = jax.random.randint(k1, (B, T_WORD), 1, V_POS, dtype=jnp.int32)
    bert_embed = jax.random.normal(k2, (B, T_WORD, D_BERT), jnp.float32)

    fwd = jax.jit(text_encoder_forward)
    out_full, lengths = fwd(params, bert_embed, input_word, input_pos)
    out_full = jax.block_until_ready(out_full)
    assert out_full.shape == (B, T_WORD, D_BERT), out_full.shape

    ref = reference_forward(params, bert_embed, input_word, input_pos)
    lmax = ref.shape[1]
    err = float(jnp.max(jnp.abs(out_full[:, :lmax] - ref)))
    assert err < 1e-4, f"max abs error {err}"

    # TODO(synk): BERT backbone / char-LSTM / transformer / context_lstm branches
    # are not exercised in this configuration (see header comment).
    print("KERNEL_OK")
</pallas_src>

<mosaic_0001>
module attributes {stable_mosaic.version = 11 : i64} {
  func.func @text_encoder_fused_kernel(%arg0: memref<64x48xf32, #tpu.memory_space<vmem>>, %arg1: memref<64x32xf32, #tpu.memory_space<vmem>>, %arg2: memref<64x32xf32, #tpu.memory_space<vmem>>, %arg3: memref<104x128xf32, #tpu.memory_space<vmem>>, %arg4: memref<72x32xf32, #tpu.memory_space<vmem>>, %arg5: memref<64x32xf32, #tpu.memory_space<vmem>>, %arg6: memref<64x64xf32, #tpu.memory_space<vmem>>) attributes {dimension_semantics = [], scalar_prefetch = 0 : i64, scratch_operands = 1 : i64, tpu.core_type = #tpu.core_type<tc>} {
    %c0 = arith.constant 0 : index
    %c0_0 = arith.constant 0 : index
    %0 = vector.load %arg3[%c0, %c0_0] : memref<104x128xf32, #tpu.memory_space<vmem>>, vector<48x128xf32>
    %c48 = arith.constant 48 : index
    %c0_1 = arith.constant 0 : index
    %1 = vector.load %arg3[%c48, %c0_1] : memref<104x128xf32, #tpu.memory_space<vmem>>, vector<32x128xf32>
    %c80 = arith.constant 80 : index
    %c0_2 = arith.constant 0 : index
    %2 = vector.load %arg3[%c80, %c0_2] : memref<104x128xf32, #tpu.memory_space<vmem>>, vector<1x128xf32>
    %c88 = arith.constant 88 : index
    %c0_3 = arith.constant 0 : index
    %3 = vector.load %arg3[%c88, %c0_3] : memref<104x128xf32, #tpu.memory_space<vmem>>, vector<1x128xf32>
    %4 = vector.shape_cast %3 : vector<1x128xf32> to vector<1x128xf32>
    %5 = vector.broadcast %4 : vector<1x128xf32> to vector<8x128xf32>
    %c96 = arith.constant 96 : index
    %c0_4 = arith.constant 0 : index
    %6 = vector.load %arg3[%c96, %c0_4] : memref<104x128xf32, #tpu.memory_space<vmem>>, vector<1x128xf32>
    %7 = vector.shape_cast %6 : vector<1x128xf32> to vector<1x128xf32>
    %8 = vector.broadcast %7 : vector<1x128xf32> to vector<8x128xf32>
    %c0_5 = arith.constant 0 : index
    %c0_6 = arith.constant 0 : index
    %9 = vector.load %arg1[%c0_5, %c0_6] : memref<64x32xf32, #tpu.memory_space<vmem>>, vector<64x32xf32>
    %cst = arith.constant 5.000000e-01 : f32
    %10 = vector.broadcast %cst : f32 to vector<64x32xf32>
    %11 = arith.cmpf ogt, %9, %10 : vector<64x32xf32>
    %c0_7 = arith.constant 0 : index
    %c0_8 = arith.constant 0 : index
    %12 = vector.load %arg0[%c0_7, %c0_8] : memref<64x48xf32, #tpu.memory_space<vmem>>, vector<64x48xf32>
    %cst_9 = arith.constant dense<0.000000e+00> : vector<64x128xf32>
    %13 = tpu.matmul %12, %0, %cst_9 {dimension_numbers = #tpu.dot_dimension_numbers<[1], [0], [0], [1], [0, 0, 1, 1], [], []>, precision = #tpu.contract_precision<fp32>} : vector<64x48xf32>, vector<48x128xf32>, vector<64x128xf32> -> vector<64x128xf32>
    %14 = vector.broadcast %2 : vector<1x128xf32> to vector<64x128xf32>
    %15 = arith.addf %13, %14 : vector<64x128xf32>
    %c0_10 = arith.constant 0 : index
    %c0_11 = arith.constant 0 : index
    %16 = vector.load %arg2[%c0_10, %c0_11] : memref<64x32xf32, #tpu.memory_space<vmem>>, vector<64x32xf32>
    %c0_12 = arith.constant 0 : index
    %c0_13 = arith.constant 0 : index
    %17 = vector.load %arg6[%c0_12, %c0_13] : memref<64x64xf32, #tpu.memory_space<vmem>>, vector<64x32xf32>
    tpu.vector_store %arg6[%c0_12, %c0_13], %16 {strides = array<i32>} : memref<64x64xf32, #tpu.memory_space<vmem>>, vector<64x32xf32>,
    %cst_14 = arith.constant 0.000000e+00 : f32
    %18 = vector.broadcast %cst_14 : f32 to vector<8x32xf32>
    %cst_15 = arith.constant 0.000000e+00 : f32
    %19 = vector.broadcast %cst_15 : f32 to vector<8x32xf32>
    %20 = vector.extract_strided_slice %15 {offsets = [0, 0], sizes = [8, 128], strides = [1, 1]} : vector<64x128xf32> to vector<8x128xf32>
    %cst_16 = arith.constant dense<0.000000e+00> : vector<8x128xf32>
    %21 = tpu.matmul %18, %1, %cst_16 {dimension_numbers = #tpu.dot_dimension_numbers<[1], [0], [0], [1], [0, 0, 1, 1], [], []>, precision = #tpu.contract_precision<fp32>} : vector<8x32xf32>, vector<32x128xf32>, vector<8x128xf32> -> vector<8x128xf32>
    %22 = arith.addf %20, %21 : vector<8x128xf32>
    %23 = math.tanh %22 : vector<8x128xf32>
    %24 = arith.mulf %23, %5 : vector<8x128xf32>
    %25 = arith.addf %24, %8 : vector<8x128xf32>
    %26 = vector.extract_strided_slice %25 {offsets = [0, 0], sizes = [8, 32], strides = [1, 1]} : vector<8x128xf32> to vector<8x32xf32>
    %27 = vector.extract_strided_slice %25 {offsets = [0, 32], sizes = [8, 32], strides = [1, 1]} : vector<8x128xf32> to vector<8x32xf32>
    %28 = vector.extract_strided_slice %25 {offsets = [0, 64], sizes = [8, 32], strides = [1, 1]} : vector<8x128xf32> to vector<8x32xf32>
    %29 = vector.extract_strided_slice %25 {offsets = [0, 96], sizes = [8, 32], strides = [1, 1]} : vector<8x128xf32> to vector<8x32xf32>
    %30 = arith.mulf %27, %19 : vector<8x32xf32>
    %31 = arith.mulf %26, %29 : vector<8x32xf32>
    %32 = arith.addf %30, %31 : vector<8x32xf32>
    %33 = math.tanh %32 : vector<8x32xf32>
    %34 = arith.mulf %28, %33 : vector<8x32xf32>
    %35 = vector.extract_strided_slice %11 {offsets = [0, 0], sizes = [8, 32], strides = [1, 1]} : vector<64x32xi1> to vector<8x32xi1>
    %36 = arith.select %35, %34, %18 : vector<8x32xi1>, vector<8x32xf32>
    %37 = arith.select %35, %32, %19 : vector<8x32xi1>, vector<8x32xf32>
    %38 = vector.extract_strided_slice %35 {offsets = [0, 0], sizes = [8, 16], strides = [1, 1]} : vector<8x32xi1> to vector<8x16xi1>
    %39 = vector.extract_strided_slice %34 {offsets = [0, 0], sizes = [8, 16], strides = [1, 1]} : vector<8x32xf32> to vector<8x16xf32>
    %cst_17 = arith.constant 0.000000e+00 : f32
    %40 = vector.broadcast %cst_17 : f32 to vector<8x16xf32>
    %41 = arith.select %38, %39, %40 : vector<8x16xi1>, vector<8x16xf32>
    %c0_18 = arith.constant 0 : index
    %c32 = arith.constant 32 : index
    %42 = vector.load %arg6[%c0_18, %c32] : memref<64x64xf32, #tpu.memory_space<vmem>>, vector<8x16xf32>
    tpu.vector_store %arg6[%c0_18, %c32], %41 {strides = array<i32>} : memref<64x64xf32, #tpu.memory_space<vmem>>, vector<8x16xf32>,
    %43 = vector.extract_strided_slice %35 {offsets = [0, 16], sizes = [8, 16], strides = [1, 1]} : vector<8x32xi1> to vector<8x16xi1>
    %44 = vector.extract_strided_slice %34 {offsets = [0, 16], sizes = [8, 16], strides = [1, 1]} : vector<8x32xf32> to vector<8x16xf32>
    %cst_19 = arith.constant 0.000000e+00 : f32
    %45 = vector.broadcast %cst_19 : f32 to vector<8x16xf32>
    %46 = arith.select %43, %44, %45 : vector<8x16xi1>, vector<8x16xf32>
    %c56 = arith.constant 56 : index
    %c48_20 = arith.constant 48 : index
    %47 = vector.load %arg6[%c56, %c48_20] : memref<64x64xf32, #tpu.memory_space<vmem>>, vector<8x16xf32>
    tpu.vector_store %arg6[%c56, %c48_20], %46 {strides = array<i32>} : memref<64x64xf32, #tpu.memory_space<vmem>>, vector<8x16xf32>,
    %48 = vector.extract_strided_slice %15 {offsets = [8, 0], sizes = [8, 128], strides = [1, 1]} : vector<64x128xf32> to vector<8x128xf32>
    %cst_21 = arith.constant dense<0.000000e+00> : vector<8x128xf32>
    %49 = tpu.matmul %36, %1, %cst_21 {dimension_numbers = #tpu.dot_dimension_numbers<[1], [0], [0], [1], [0, 0, 1, 1], [], []>, precision = #tpu.contract_precision<fp32>} : vector<8x32xf32>, vector<32x128xf32>, vector<8x128xf32> -> vector<8x128xf32>
    %50 = arith.addf %48, %49 : vector<8x128xf32>
    %51 = math.tanh %50 : vector<8x128xf32>
    %52 = arith.mulf %51, %5 : vector<8x128xf32>
    %53 = arith.addf %52, %8 : vector<8x128xf32>
    %54 = vector.extract_strided_slice %53 {offsets = [0, 0], sizes = [8, 32], strides = [1, 1]} : vector<8x128xf32> to vector<8x32xf32>
    %55 = vector.extract_strided_slice %53 {offsets = [0, 32], sizes = [8, 32], strides = [1, 1]} : vector<8x128xf32> to vector<8x32xf32>
    %56 = vector.extract_strided_slice %53 {offsets = [0, 64], sizes = [8, 32], strides = [1, 1]} : vector<8x128xf32> to vector<8x32xf32>
    %57 = vector.extract_strided_slice %53 {offsets = [0, 96], sizes = [8, 32], strides = [1, 1]} : vector<8x128xf32> to vector<8x32xf32>
    %58 = arith.mulf %55, %37 : vector<8x32xf32>
    %59 = arith.mulf %54, %57 : vector<8x32xf32>
    %60 = arith.addf %58, %59 : vector<8x32xf32>
    %61 = math.tanh %60 : vector<8x32xf32>
    %62 = arith.mulf %56, %61 : vector<8x32xf32>
    %63 = vector.extract_strided_slice %11 {offsets = [8, 0], sizes = [8, 32], strides = [1, 1]} : vector<64x32xi1> to vector<8x32xi1>
    %64 = arith.select %63, %62, %36 : vector<8x32xi1>, vector<8x32xf32>
    %65 = arith.select %63, %60, %37 : vector<8x32xi1>, vector<8x32xf32>
    %66 = vector.extract_strided_slice %63 {offsets = [0, 0], sizes = [8, 16], strides = [1, 1]} : vector<8x32xi1> to vector<8x16xi1>
    %67 = vector.extract_strided_slice %62 {offsets = [0, 0], sizes = [8, 16], strides = [1, 1]} : vector<8x32xf32> to vector<8x16xf32>
    %cst_22 = arith.constant 0.000000e+00 : f32
    %68 = vector.broadcast %cst_22 : f32 to vector<8x16xf32>
    %69 = arith.select %66, %67, %68 : vector<8x16xi1>, vector<8x16xf32>
    %c8 = arith.constant 8 : index
    %c32_23 = arith.constant 32 : index
    %70 = vector.load %arg6[%c8, %c32_23] : memref<64x64xf32, #tpu.memory_space<vmem>>, vector<8x16xf32>
    tpu.vector_store %arg6[%c8, %c32_23], %69 {strides = array<i32>} : memref<64x64xf32, #tpu.memory_space<vmem>>, vector<8x16xf32>,
    %71 = vector.extract_strided_slice %63 {offsets = [0, 16], sizes = [8, 16], strides = [1, 1]} : vector<8x32xi1> to vector<8x16xi1>
    %72 = vector.extract_strided_slice %62 {offsets = [0, 16], sizes = [8, 16], strides = [1, 1]} : vector<8x32xf32> to vector<8x16xf32>
    %cst_24 = arith.constant 0.000000e+00 : f32
    %73 = vector.broadcast %cst_24 : f32 to vector<8x16xf32>
    %74 = arith.select %71, %72, %73 : vector<8x16xi1>, vector<8x16xf32>
    %c48_25 = arith.constant 48 : index
    %c48_26 = arith.constant 48 : index
    %75 = vector.load %arg6[%c48_25, %c48_26] : memref<64x64xf32, #tpu.memory_space<vmem>>, vector<8x16xf32>
    tpu.vector_store %arg6[%c48_25, %c48_26], %74 {strides = array<i32>} : memref<64x64xf32, #tpu.memory_space<vmem>>, vector<8x16xf32>,
    %76 = vector.extract_strided_slice %15 {offsets = [16, 0], sizes = [8, 128], strides = [1, 1]} : vector<64x128xf32> to vector<8x128xf32>
    %cst_27 = arith.constant dense<0.000000e+00> : vector<8x128xf32>
    %77 = tpu.matmul %64, %1, %cst_27 {dimension_numbers = #tpu.dot_dimension_numbers<[1], [0], [0], [1], [0, 0, 1, 1], [], []>, precision = #tpu.contract_precision<fp32>} : vector<8x32xf32>, vector<32x128xf32>, vector<8x128xf32> -> vector<8x128xf32>
    %78 = arith.addf %76, %77 : vector<8x128xf32>
    %79 = math.tanh %78 : vector<8x128xf32>
    %80 = arith.mulf %79, %5 : vector<8x128xf32>
    %81 = arith.addf %80, %8 : vector<8x128xf32>
    %82 = vector.extract_strided_slice %81 {offsets = [0, 0], sizes = [8, 32], strides = [1, 1]} : vector<8x128xf32> to vector<8x32xf32>
    %83 = vector.extract_strided_slice %81 {offsets = [0, 32], sizes = [8, 32], strides = [1, 1]} : vector<8x128xf32> to vector<8x32xf32>
    %84 = vector.extract_strided_slice %81 {offsets = [0, 64], sizes = [8, 32], strides = [1, 1]} : vector<8x128xf32> to vector<8x32xf32>
    %85 = vector.extract_strided_slice %81 {offsets = [0, 96], sizes = [8, 32], strides = [1, 1]} : vector<8x128xf32> to vector<8x32xf32>
    %86 = arith.mulf %83, %65 : vector<8x32xf32>
    %87 = arith.mulf %82, %85 : vector<8x32xf32>
    %88 = arith.addf %86, %87 : vector<8x32xf32>
    %89 = math.tanh %88 : vector<8x32xf32>
    %90 = arith.mulf %84, %89 : vector<8x32xf32>
    %91 = vector.extract_strided_slice %11 {offsets = [16, 0], sizes = [8, 32], strides = [1, 1]} : vector<64x32xi1> to vector<8x32xi1>
    %92 = arith.select %91, %90, %64 : vector<8x32xi1>, vector<8x32xf32>
    %93 = arith.select %91, %88, %65 : vector<8x32xi1>, vector<8x32xf32>
    %94 = vector.extract_strided_slice %91 {offsets = [0, 0], sizes = [8, 16], strides = [1, 1]} : vector<8x32xi1> to vector<8x16xi1>
    %95 = vector.extract_strided_slice %90 {offsets = [0, 0], sizes = [8, 16], strides = [1, 1]} : vector<8x32xf32> to vector<8x16xf32>
    %cst_28 = arith.constant 0.000000e+00 : f32
    %96 = vector.broadcast %cst_28 : f32 to vector<8x16xf32>
    %97 = arith.select %94, %95, %96 : vector<8x16xi1>, vector<8x16xf32>
    %c16 = arith.constant 16 : index
    %c32_29 = arith.constant 32 : index
    %98 = vector.load %arg6[%c16, %c32_29] : memref<64x64xf32, #tpu.memory_space<vmem>>, vector<8x16xf32>
    tpu.vector_store %arg6[%c16, %c32_29], %97 {strides = array<i32>} : memref<64x64xf32, #tpu.memory_space<vmem>>, vector<8x16xf32>,
    %99 = vector.extract_strided_slice %91 {offsets = [0, 16], sizes = [8, 16], strides = [1, 1]} : vector<8x32xi1> to vector<8x16xi1>
    %100 = vector.extract_strided_slice %90 {offsets = [0, 16], sizes = [8, 16], strides = [1, 1]} : vector<8x32xf32> to vector<8x16xf32>
    %cst_30 = arith.constant 0.000000e+00 : f32
    %101 = vector.broadcast %cst_30 : f32 to vector<8x16xf32>
    %102 = arith.select %99, %100, %101 : vector<8x16xi1>, vector<8x16xf32>
    %c40 = arith.constant 40 : index
    %c48_31 = arith.constant 48 : index
    %103 = vector.load %arg6[%c40, %c48_31] : memref<64x64xf32, #tpu.memory_space<vmem>>, vector<8x16xf32>
    tpu.vector_store %arg6[%c40, %c48_31], %102 {strides = array<i32>} : memref<64x64xf32, #tpu.memory_space<vmem>>, vector<8x16xf32>,
    %104 = vector.extract_strided_slice %15 {offsets = [24, 0], sizes = [8, 128], strides = [1, 1]} : vector<64x128xf32> to vector<8x128xf32>
    %cst_32 = arith.constant dense<0.000000e+00> : vector<8x128xf32>
    %105 = tpu.matmul %92, %1, %cst_32 {dimension_numbers = #tpu.dot_dimension_numbers<[1], [0], [0], [1], [0, 0, 1, 1], [], []>, precision = #tpu.contract_precision<fp32>} : vector<8x32xf32>, vector<32x128xf32>, vector<8x128xf32> -> vector<8x128xf32>
    %106 = arith.addf %104, %105 : vector<8x128xf32>
    %107 = math.tanh %106 : vector<8x128xf32>
    %108 = arith.mulf %107, %5 : vector<8x128xf32>
    %109 = arith.addf %108, %8 : vector<8x128xf32>
    %110 = vector.extract_strided_slice %109 {offsets = [0, 0], sizes = [8, 32], strides = [1, 1]} : vector<8x128xf32> to vector<8x32xf32>
    %111 = vector.extract_strided_slice %109 {offsets = [0, 32], sizes = [8, 32], strides = [1, 1]} : vector<8x128xf32> to vector<8x32xf32>
    %112 = vector.extract_strided_slice %109 {offsets = [0, 64], sizes = [8, 32], strides = [1, 1]} : vector<8x128xf32> to vector<8x32xf32>
    %113 = vector.extract_strided_slice %109 {offsets = [0, 96], sizes = [8, 32], strides = [1, 1]} : vector<8x128xf32> to vector<8x32xf32>
    %114 = arith.mulf %111, %93 : vector<8x32xf32>
    %115 = arith.mulf %110, %113 : vector<8x32xf32>
    %116 = arith.addf %114, %115 : vector<8x32xf32>
    %117 = math.tanh %116 : vector<8x32xf32>
    %118 = arith.mulf %112, %117 : vector<8x32xf32>
    %119 = vector.extract_strided_slice %11 {offsets = [24, 0], sizes = [8, 32], strides = [1, 1]} : vector<64x32xi1> to vector<8x32xi1>
    %120 = arith.select %119, %118, %92 : vector<8x32xi1>, vector<8x32xf32>
    %121 = arith.select %119, %116, %93 : vector<8x32xi1>, vector<8x32xf32>
    %122 = vector.extract_strided_slice %119 {offsets = [0, 0], sizes = [8, 16], strides = [1, 1]} : vector<8x32xi1> to vector<8x16xi1>
    %123 = vector.extract_strided_slice %118 {offsets = [0, 0], sizes = [8, 16], strides = [1, 1]} : vector<8x32xf32> to vector<8x16xf32>
    %cst_33 = arith.constant 0.000000e+00 : f32
    %124 = vector.broadcast %cst_33 : f32 to vector<8x16xf32>
    %125 = arith.select %122, %123, %124 : vector<8x16xi1>, vector<8x16xf32>
    %c24 = arith.constant 24 : index
    %c32_34 = arith.constant 32 : index
    %126 = vector.load %arg6[%c24, %c32_34] : memref<64x64xf32, #tpu.memory_space<vmem>>, vector<8x16xf32>
    tpu.vector_store %arg6[%c24, %c32_34], %125 {strides = array<i32>} : memref<64x64xf32, #tpu.memory_space<vmem>>, vector<8x16xf32>,
    %127 = vector.extract_strided_slice %119 {offsets = [0, 16], sizes = [8, 16], strides = [1, 1]} : vector<8x32xi1> to vector<8x16xi1>
    %128 = vector.extract_strided_slice %118 {offsets = [0, 16], sizes = [8, 16], strides = [1, 1]} : vector<8x32xf32> to vector<8x16xf32>
    %cst_35 = arith.constant 0.000000e+00 : f32
    %129 = vector.broadcast %cst_35 : f32 to vector<8x16xf32>
    %130 = arith.select %127, %128, %129 : vector<8x16xi1>, vector<8x16xf32>
    %c32_36 = arith.constant 32 : index
    %c48_37 = arith.constant 48 : index
    %131 = vector.load %arg6[%c32_36, %c48_37] : memref<64x64xf32, #tpu.memory_space<vmem>>, vector<8x16xf32>
    tpu.vector_store %arg6[%c32_36, %c48_37], %130 {strides = array<i32>} : memref<64x64xf32, #tpu.memory_space<vmem>>, vector<8x16xf32>,
    %132 = vector.extract_strided_slice %15 {offsets = [32, 0], sizes = [8, 128], strides = [1, 1]} : vector<64x128xf32> to vector<8x128xf32>
    %cst_38 = arith.constant dense<0.000000e+00> : vector<8x128xf32>
    %133 = tpu.matmul %120, %1, %cst_38 {dimension_numbers = #tpu.dot_dimension_numbers<[1], [0], [0], [1], [0, 0, 1, 1], [], []>, precision = #tpu.contract_precision<fp32>} : vector<8x32xf32>, vector<32x128xf32>, vector<8x128xf32> -> vector<8x128xf32>
    %134 = arith.addf %132, %133 : vector<8x128xf32>
    %135 = math.tanh %134 : vector<8x128xf32>
    %136 = arith.mulf %135, %5 : vector<8x128xf32>
    %137 = arith.addf %136, %8 : vector<8x128xf32>
    %138 = vector.extract_strided_slice %137 {offsets = [0, 0], sizes = [8, 32], strides = [1, 1]} : vector<8x128xf32> to vector<8x32xf32>
    %139 = vector.extract_strided_slice %137 {offsets = [0, 32], sizes = [8, 32], strides = [1, 1]} : vector<8x128xf32> to vector<8x32xf32>
    %140 = vector.extract_strided_slice %137 {offsets = [0, 64], sizes = [8, 32], strides = [1, 1]} : vector<8x128xf32> to vector<8x32xf32>
    %141 = vector.extract_strided_slice %137 {offsets = [0, 96], sizes = [8, 32], strides = [1, 1]} : vector<8x128xf32> to vector<8x32xf32>
    %142 = arith.mulf %139, %121 : vector<8x32xf32>
    %143 = arith.mulf %138, %141 : vector<8x32xf32>
    %144 = arith.addf %142, %143 : vector<8x32xf32>
    %145 = math.tanh %144 : vector<8x32xf32>
    %146 = arith.mulf %140, %145 : vector<8x32xf32>
    %147 = vector.extract_strided_slice %11 {offsets = [32, 0], sizes = [8, 32], strides = [1, 1]} : vector<64x32xi1> to vector<8x32xi1>
    %148 = arith.select %147, %146, %120 : vector<8x32xi1>, vector<8x32xf32>
    %149 = arith.select %147, %144, %121 : vector<8x32xi1>, vector<8x32xf32>
    %150 = vector.extract_strided_slice %147 {offsets = [0, 0], sizes = [8, 16], strides = [1, 1]} : vector<8x32xi1> to vector<8x16xi1>
    %151 = vector.extract_strided_slice %146 {offsets = [0, 0], sizes = [8, 16], strides = [1, 1]} : vector<8x32xf32> to vector<8x16xf32>
    %cst_39 = arith.constant 0.000000e+00 : f32
    %152 = vector.broadcast %cst_39 : f32 to vector<8x16xf32>
    %153 = arith.select %150, %151, %152 : vector<8x16xi1>, vector<8x16xf32>
    %c32_40 = arith.constant 32 : index
    %c32_41 = arith.constant 32 : index
    %154 = vector.load %arg6[%c32_40, %c32_41] : memref<64x64xf32, #tpu.memory_space<vmem>>, vector<8x16xf32>
    tpu.vector_store %arg6[%c32_40, %c32_41], %153 {strides = array<i32>} : memref<64x64xf32, #tpu.memory_space<vmem>>, vector<8x16xf32>,
    %155 = vector.extract_strided_slice %147 {offsets = [0, 16], sizes = [8, 16], strides = [1, 1]} : vector<8x32xi1> to vector<8x16xi1>
    %156 = vector.extract_strided_slice %146 {offsets = [0, 16], sizes = [8, 16], strides = [1, 1]} : vector<8x32xf32> to vector<8x16xf32>
    %cst_42 = arith.constant 0.000000e+00 : f32
    %157 = vector.broadcast %cst_42 : f32 to vector<8x16xf32>
    %158 = arith.select %155, %156, %157 : vector<8x16xi1>, vector<8x16xf32>
    %c24_43 = arith.constant 24 : index
    %c48_44 = arith.constant 48 : index
    %159 = vector.load %arg6[%c24_43, %c48_44] : memref<64x64xf32, #tpu.memory_space<vmem>>, vector<8x16xf32>
    tpu.vector_store %arg6[%c24_43, %c48_44], %158 {strides = array<i32>} : memref<64x64xf32, #tpu.memory_space<vmem>>, vector<8x16xf32>,
    %160 = vector.extract_strided_slice %15 {offsets = [40, 0], sizes = [8, 128], strides = [1, 1]} : vector<64x128xf32> to vector<8x128xf32>
    %cst_45 = arith.constant dense<0.000000e+00> : vector<8x128xf32>
    %161 = tpu.matmul %148, %1, %cst_45 {dimension_numbers = #tpu.dot_dimension_numbers<[1], [0], [0], [1], [0, 0, 1, 1], [], []>, precision = #tpu.contract_precision<fp32>} : vector<8x32xf32>, vector<32x128xf32>, vector<8x128xf32> -> vector<8x128xf32>
    %162 = arith.addf %160, %161 : vector<8x128xf32>
    %163 = math.tanh %162 : vector<8x128xf32>
    %164 = arith.mulf %163, %5 : vector<8x128xf32>
    %165 = arith.addf %164, %8 : vector<8x128xf32>
    %166 = vector.extract_strided_slice %165 {offsets = [0, 0], sizes = [8, 32], strides = [1, 1]} : vector<8x128xf32> to vector<8x32xf32>
    %167 = vector.extract_strided_slice %165 {offsets = [0, 32], sizes = [8, 32], strides = [1, 1]} : vector<8x128xf32> to vector<8x32xf32>
    %168 = vector.extract_strided_slice %165 {offsets = [0, 64], sizes = [8, 32], strides = [1, 1]} : vector<8x128xf32> to vector<8x32xf32>
    %169 = vector.extract_strided_slice %165 {offsets = [0, 96], sizes = [8, 32], strides = [1, 1]} : vector<8x128xf32> to vector<8x32xf32>
    %170 = arith.mulf %167, %149 : vector<8x32xf32>
    %171 = arith.mulf %166, %169 : vector<8x32xf32>
    %172 = arith.addf %170, %171 : vector<8x32xf32>
    %173 = math.tanh %172 : vector<8x32xf32>
    %174 = arith.mulf %168, %173 : vector<8x32xf32>
    %175 = vector.extract_strided_slice %11 {offsets = [40, 0], sizes = [8, 32], strides = [1, 1]} : vector<64x32xi1> to vector<8x32xi1>
    %176 = arith.select %175, %174, %148 : vector<8x32xi1>, vector<8x32xf32>
    %177 = arith.select %175, %172, %149 : vector<8x32xi1>, vector<8x32xf32>
    %178 = vector.extract_strided_slice %175 {offsets = [0, 0], sizes = [8, 16], strides = [1, 1]} : vector<8x32xi1> to vector<8x16xi1>
    %179 = vector.extract_strided_slice %174 {offsets = [0, 0], sizes = [8, 16], strides = [1, 1]} : vector<8x32xf32> to vector<8x16xf32>
    %cst_46 = arith.constant 0.000000e+00 : f32
    %180 = vector.broadcast %cst_46 : f32 to vector<8x16xf32>
    %181 = arith.select %178, %179, %180 : vector<8x16xi1>, vector<8x16xf32>
    %c40_47 = arith.constant 40 : index
    %c32_48 = arith.constant 32 : index
    %182 = vector.load %arg6[%c40_47, %c32_48] : memref<64x64xf32, #tpu.memory_space<vmem>>, vector<8x16xf32>
    tpu.vector_store %arg6[%c40_47, %c32_48], %181 {strides = array<i32>} : memref<64x64xf32, #tpu.memory_space<vmem>>, vector<8x16xf32>,
    %183 = vector.extract_strided_slice %175 {offsets = [0, 16], sizes = [8, 16], strides = [1, 1]} : vector<8x32xi1> to vector<8x16xi1>
    %184 = vector.extract_strided_slice %174 {offsets = [0, 16], sizes = [8, 16], strides = [1, 1]} : vector<8x32xf32> to vector<8x16xf32>
    %cst_49 = arith.constant 0.000000e+00 : f32
    %185 = vector.broadcast %cst_49 : f32 to vector<8x16xf32>
    %186 = arith.select %183, %184, %185 : vector<8x16xi1>, vector<8x16xf32>
    %c16_50 = arith.constant 16 : index
    %c48_51 = arith.constant 48 : index
    %187 = vector.load %arg6[%c16_50, %c48_51] : memref<64x64xf32, #tpu.memory_space<vmem>>, vector<8x16xf32>
    tpu.vector_store %arg6[%c16_50, %c48_51], %186 {strides = array<i32>} : memref<64x64xf32, #tpu.memory_space<vmem>>, vector<8x16xf32>,
    %188 = vector.extract_strided_slice %15 {offsets = [48, 0], sizes = [8, 128], strides = [1, 1]} : vector<64x128xf32> to vector<8x128xf32>
    %cst_52 = arith.constant dense<0.000000e+00> : vector<8x128xf32>
    %189 = tpu.matmul %176, %1, %cst_52 {dimension_numbers = #tpu.dot_dimension_numbers<[1], [0], [0], [1], [0, 0, 1, 1], [], []>, precision = #tpu.contract_precision<fp32>} : vector<8x32xf32>, vector<32x128xf32>, vector<8x128xf32> -> vector<8x128xf32>
    %190 = arith.addf %188, %189 : vector<8x128xf32>
    %191 = math.tanh %190 : vector<8x128xf32>
    %192 = arith.mulf %191, %5 : vector<8x128xf32>
    %193 = arith.addf %192, %8 : vector<8x128xf32>
    %194 = vector.extract_strided_slice %193 {offsets = [0, 0], sizes = [8, 32], strides = [1, 1]} : vector<8x128xf32> to vector<8x32xf32>
    %195 = vector.extract_strided_slice %193 {offsets = [0, 32], sizes = [8, 32], strides = [1, 1]} : vector<8x128xf32> to vector<8x32xf32>
    %196 = vector.extract_strided_slice %193 {offsets = [0, 64], sizes = [8, 32], strides = [1, 1]} : vector<8x128xf32> to vector<8x32xf32>
    %197 = vector.extract_strided_slice %193 {offsets = [0, 96], sizes = [8, 32], strides = [1, 1]} : vector<8x128xf32> to vector<8x32xf32>
    %198 = arith.mulf %195, %177 : vector<8x32xf32>
    %199 = arith.mulf %194, %197 : vector<8x32xf32>
    %200 = arith.addf %198, %199 : vector<8x32xf32>
    %201 = math.tanh %200 : vector<8x32xf32>
    %202 = arith.mulf %196, %201 : vector<8x32xf32>
    %203 = vector.extract_strided_slice %11 {offsets = [48, 0], sizes = [8, 32], strides = [1, 1]} : vector<64x32xi1> to vector<8x32xi1>
    %204 = arith.select %203, %202, %176 : vector<8x32xi1>, vector<8x32xf32>
    %205 = arith.select %203, %200, %177 : vector<8x32xi1>, vector<8x32xf32>
    %206 = vector.extract_strided_slice %203 {offsets = [0, 0], sizes = [8, 16], strides = [1, 1]} : vector<8x32xi1> to vector<8x16xi1>
    %207 = vector.extract_strided_slice %202 {offsets = [0, 0], sizes = [8, 16], strides = [1, 1]} : vector<8x32xf32> to vector<8x16xf32>
    %cst_53 = arith.constant 0.000000e+00 : f32
    %208 = vector.broadcast %cst_53 : f32 to vector<8x16xf32>
    %209 = arith.select %206, %207, %208 : vector<8x16xi1>, vector<8x16xf32>
    %c48_54 = arith.constant 48 : index
    %c32_55 = arith.constant 32 : index
    %210 = vector.load %arg6[%c48_54, %c32_55] : memref<64x64xf32, #tpu.memory_space<vmem>>, vector<8x16xf32>
    tpu.vector_store %arg6[%c48_54, %c32_55], %209 {strides = array<i32>} : memref<64x64xf32, #tpu.memory_space<vmem>>, vector<8x16xf32>,
    %211 = vector.extract_strided_slice %203 {offsets = [0, 16], sizes = [8, 16], strides = [1, 1]} : vector<8x32xi1> to vector<8x16xi1>
    %212 = vector.extract_strided_slice %202 {offsets = [0, 16], sizes = [8, 16], strides = [1, 1]} : vector<8x32xf32> to vector<8x16xf32>
    %cst_56 = arith.constant 0.000000e+00 : f32
    %213 = vector.broadcast %cst_56 : f32 to vector<8x16xf32>
    %214 = arith.select %211, %212, %213 : vector<8x16xi1>, vector<8x16xf32>
    %c8_57 = arith.constant 8 : index
    %c48_58 = arith.constant 48 : index
    %215 = vector.load %arg6[%c8_57, %c48_58] : memref<64x64xf32, #tpu.memory_space<vmem>>, vector<8x16xf32>
    tpu.vector_store %arg6[%c8_57, %c48_58], %214 {strides = array<i32>} : memref<64x64xf32, #tpu.memory_space<vmem>>, vector<8x16xf32>,
    %216 = vector.extract_strided_slice %15 {offsets = [56, 0], sizes = [8, 128], strides = [1, 1]} : vector<64x128xf32> to vector<8x128xf32>
    %cst_59 = arith.constant dense<0.000000e+00> : vector<8x128xf32>
    %217 = tpu.matmul %204, %1, %cst_59 {dimension_numbers = #tpu.dot_dimension_numbers<[1], [0], [0], [1], [0, 0, 1, 1], [], []>, precision = #tpu.contract_precision<fp32>} : vector<8x32xf32>, vector<32x128xf32>, vector<8x128xf32> -> vector<8x128xf32>
    %218 = arith.addf %216, %217 : vector<8x128xf32>
    %219 = math.tanh %218 : vector<8x128xf32>
    %220 = arith.mulf %219, %5 : vector<8x128xf32>
    %221 = arith.addf %220, %8 : vector<8x128xf32>
    %222 = vector.extract_strided_slice %221 {offsets = [0, 0], sizes = [8, 32], strides = [1, 1]} : vector<8x128xf32> to vector<8x32xf32>
    %223 = vector.extract_strided_slice %221 {offsets = [0, 32], sizes = [8, 32], strides = [1, 1]} : vector<8x128xf32> to vector<8x32xf32>
    %224 = vector.extract_strided_slice %221 {offsets = [0, 64], sizes = [8, 32], strides = [1, 1]} : vector<8x128xf32> to vector<8x32xf32>
    %225 = vector.extract_strided_slice %221 {offsets = [0, 96], sizes = [8, 32], strides = [1, 1]} : vector<8x128xf32> to vector<8x32xf32>
    %226 = arith.mulf %223, %205 : vector<8x32xf32>
    %227 = arith.mulf %222, %225 : vector<8x32xf32>
    %228 = arith.addf %226, %227 : vector<8x32xf32>
    %229 = math.tanh %228 : vector<8x32xf32>
    %230 = arith.mulf %224, %229 : vector<8x32xf32>
    %231 = vector.extract_strided_slice %11 {offsets = [56, 0], sizes = [8, 32], strides = [1, 1]} : vector<64x32xi1> to vector<8x32xi1>
    %232 = vector.extract_strided_slice %231 {offsets = [0, 0], sizes = [8, 16], strides = [1, 1]} : vector<8x32xi1> to vector<8x16xi1>
    %233 = vector.extract_strided_slice %230 {offsets = [0, 0], sizes = [8, 16], strides = [1, 1]} : vector<8x32xf32> to vector<8x16xf32>
    %cst_60 = arith.constant 0.000000e+00 : f32
    %234 = vector.broadcast %cst_60 : f32 to vector<8x16xf32>
    %235 = arith.select %232, %233, %234 : vector<8x16xi1>, vector<8x16xf32>
    %c56_61 = arith.constant 56 : index
    %c32_62 = arith.constant 32 : index
    %236 = vector.load %arg6[%c56_61, %c32_62] : memref<64x64xf32, #tpu.memory_space<vmem>>, vector<8x16xf32>
    tpu.vector_store %arg6[%c56_61, %c32_62], %235 {strides = array<i32>} : memref<64x64xf32, #tpu.memory_space<vmem>>, vector<8x16xf32>,
    %237 = vector.extract_strided_slice %231 {offsets = [0, 16], sizes = [8, 16], strides = [1, 1]} : vector<8x32xi1> to vector<8x16xi1>
    %238 = vector.extract_strided_slice %230 {offsets = [0, 16], sizes = [8, 16], strides = [1, 1]} : vector<8x32xf32> to vector<8x16xf32>
    %cst_63 = arith.constant 0.000000e+00 : f32
    %239 = vector.broadcast %cst_63 : f32 to vector<8x16xf32>
    %240 = arith.select %237, %238, %239 : vector<8x16xi1>, vector<8x16xf32>
    %c0_64 = arith.constant 0 : index
    %c48_65 = arith.constant 48 : index
    %241 = vector.load %arg6[%c0_64, %c48_65] : memref<64x64xf32, #tpu.memory_space<vmem>>, vector<8x16xf32>
    tpu.vector_store %arg6[%c0_64, %c48_65], %240 {strides = array<i32>} : memref<64x64xf32, #tpu.memory_space<vmem>>, vector<8x16xf32>,
    %c0_66 = arith.constant 0 : index
    %c0_67 = arith.constant 0 : index
    %242 = vector.load %arg4[%c0_66, %c0_67] : memref<72x32xf32, #tpu.memory_space<vmem>>, vector<64x32xf32>
    %c64 = arith.constant 64 : index
    %c0_68 = arith.constant 0 : index
    %243 = vector.load %arg4[%c64, %c0_68] : memref<72x32xf32, #tpu.memory_space<vmem>>, vector<1x32xf32>
    %c0_69 = arith.constant 0 : index
    %c0_70 = arith.constant 0 : index
    %244 = vector.load %arg6[%c0_69, %c0_70] : memref<64x64xf32, #tpu.memory_space<vmem>>, vector<64x64xf32>
    %cst_71 = arith.constant dense<0.000000e+00> : vector<64x32xf32>
    %245 = tpu.matmul %244, %242, %cst_71 {dimension_numbers = #tpu.dot_dimension_numbers<[1], [0], [0], [1], [0, 0, 1, 1], [], []>, precision = #tpu.contract_precision<fp32>} : vector<64x64xf32>, vector<64x32xf32>, vector<64x32xf32> -> vector<64x32xf32>
    %246 = vector.broadcast %243 : vector<1x32xf32> to vector<64x32xf32>
    %247 = arith.addf %245, %246 : vector<64x32xf32>
    %c0_72 = arith.constant 0 : index
    %c0_73 = arith.constant 0 : index
    %248 = vector.load %arg5[%c0_72, %c0_73] : memref<64x32xf32, #tpu.memory_space<vmem>>, vector<64x32xf32>
    tpu.vector_store %arg5[%c0_72, %c0_73], %247 {strides = array<i32>} : memref<64x32xf32, #tpu.memory_space<vmem>>, vector<64x32xf32>,
    return
  }
}

</mosaic_0001>

<bundles_post_ra>
// kernel: text_encoder_forward.1
= control target key start
LH: loop header
LB: loop body
LE: loop exit
PB: predicated region body
PF: predicated region fallthrough
CT: control target
= control target key end

     0   :  { %vm60_vm0 = vcmask 392192   ;;  %s2925_s9 = smov 32   ;;  %s2926_s10 = smov 96   ;;  %vm521_vm2 = vcmask 261120   ;;  %vm753_vm9 = vcmask 392448   ;;  %vm755_vm10 = vcmask 523648   ;;  %s4047_s3 = inlined_call_operand.vmem [shape: f32[104,128], index: 3, kind: input, shape index: {}]   ;;  %s4048_s0 = inlined_call_operand.vmem [shape: f32[64,48], index: 0, kind: input, shape index: {}]   ;;  %s4049_s1 = inlined_call_operand.vmem [shape: f32[64,32], index: 1, kind: input, shape index: {}]   ;;  %s4050_s2 = inlined_call_operand.vmem [shape: f32[64,32], index: 2, kind: input, shape index: {}]   ;;  %s4051_s4 = inlined_call_operand.vmem [shape: f32[72,32], index: 4, kind: input, shape index: {}]   ;;  %s4052_s5 = inlined_call_operand.vmem [shape: f32[64,32], index: 5, kind: output, shape index: {}]  }
   0x1   :  { %v25_v0 = vld [vmem:[%s4047_s3 + $0x28] sm:$0xff]  ;;  %v24_v2 = vld [vmem:[%s4047_s3 + $0x20] sm:$0xff]  ;;  %v23_v4 = vld [vmem:[%s4047_s3 + $0x18] sm:$0xff]  ;;  %s2927_s13 = smov 64   ;;  %vm2378_vm12 = vcmask 523264  }
   0x2   :  { %v2961_v1 = vand.u32 4294901760, %v25_v0  ;;  %v2966_v3 = vand.u32 4294901760, %v24_v2  ;;  %v22_v5 = vld [vmem:[%s4047_s3 + $0x10] sm:$0xff]  ;;  %v21_v6 = vld [vmem:[%s4047_s3 + $0x8] sm:$0xff]  ;;  %v2978_v7 = vand.u32 4294901760, %v23_v4  ;;  %v20_v11 = vld [vmem:[%s4047_s3] sm:$0xff] }
   0x3   :  { %v2980_v8 = vand.u32 4294901760, %v22_v5  ;;  %v2982_v9 = vand.u32 4294901760, %v21_v6  ;;  %v55_v12 = vld [vmem:[%s4048_s0 + $0x20] sm:$0xff]  ;;  %v56_v13 = vld [vmem:[%s4048_s0 + $0x28] sm:$0xff]  ;;  %v2997_v14 = vand.u32 4294901760, %v20_v11  ;;  %v57_v41 = vld [vmem:[%s4048_s0 + $0x30] sm:$0xff] }
   0x4   :  { %2869 = vmatpush.msra.mxu2 %v2961_v1  ;;  %v2985_v10 = vsub.f32 %v25_v0, %v2961_v1  ;;  %96 = vmatpush.msra.mxu0 %v2961_v1  ;;  %v3000_v15 = vsub.f32 %v24_v2, %v2966_v3  ;;  %v74_v16 = vsel %vm60_vm0, %v55_v12, 0  ;;  %v77_v17 = vsel %vm60_vm0, %v56_v13, 0  ;;  %v51_v34 = vld [vmem:[%s4048_s0] sm:$0xff]  ;;  %v52_v42 = vld [vmem:[%s4048_s0 + $0x8] sm:$0xff]  ;;  %v53_v49 = vld [vmem:[%s4048_s0 + $0x10] sm:$0xff] }
   0x5   :  { %v3006_v19 = vand.u32 4294901760, %v74_v16  ;;  %v3009_v20 = vsub.f32 %v23_v4, %v2978_v7  ;;  %v3012_v21 = vsub.f32 %v22_v5, %v2980_v8  ;;  %v3017_v23 = vsub.f32 %v21_v6, %v2982_v9  ;;  %v58_v54 = vld [vmem:[%s4048_s0 + $0x38] sm:$0xff]  ;;  %v29_v61 = vld [vmem:[%s4047_s3 + $0x48] sm:$0xff] }
   0x6   :  { %2870 = vmatpush.msra.mxu2 %v2966_v3  ;;  %v184_v18 = vand.u32 4294901760, %v2985_v10  ;;  %98 = vmatpush.msra.mxu0 %v2966_v3  ;;  %v190_v22 = vand.u32 4294901760, %v3000_v15  ;;  %v3020_v24 = vsub.f32 %v20_v11, %v2997_v14  ;;  %v3022_v25 = vand.u32 4294901760, %v77_v17 }
   0x7   :  { %v3029_v27 = vsub.f32 %v74_v16, %v3006_v19  ;;  %v196_v28 = vand.u32 4294901760, %v3009_v20  ;;  %v202_v29 = vand.u32 4294901760, %v3012_v21  ;;  %v208_v31 = vand.u32 4294901760, %v3017_v23 }
   0x8   :  { %2871 = vmatpush.msra.mxu2 %v2978_v7  ;;  %v185_v26 = vsub.f32 %v2985_v10, %v184_v18  ;;  %100 = vmatpush.msra.mxu0 %v2978_v7  ;;  %v191_v30 = vsub.f32 %v3000_v15, %v190_v22  ;;  %v214_v32 = vand.u32 4294901760, %v3020_v24  ;;  %v3040_v33 = vsub.f32 %v77_v17, %v3022_v25 }
   0x9   :  { %v141_v36 = vand.u32 4294901760, %v3029_v27  ;;  %v197_v37 = vsub.f32 %v3009_v20, %v196_v28  ;;  %v203_v38 = vsub.f32 %v3012_v21, %v202_v29  ;;  %v209_v40 = vsub.f32 %v3017_v23, %v208_v31 }
   0xa   :  { %2872 = vmatpush.msra.mxu2 %v2980_v8  ;;  %v186_v35 = vand.u32 4294901760, %v185_v26  ;;  %102 = vmatpush.msra.mxu0 %v2980_v8  ;;  %v192_v39 = vand.u32 4294901760, %v191_v30  ;;  %v149_v45 = vand.u32 4294901760, %v3040_v33  ;;  %v62_v46 = vsel %vm60_vm0, %v51_v34, 0  ;;  %v54_v30 = vld [vmem:[%s4048_s0 + $0x18] sm:$0xff] }
   0xb   :  { %v142_v43 = vsub.f32 %v3029_v27, %v141_v36  ;;  %v198_v44 = vand.u32 4294901760, %v197_v37  ;;  %v215_v47 = vsub.f32 %v3020_v24, %v214_v32  ;;  %v3073_v48 = vand.u32 4294901760, %v62_v46  ;;  %v28_v37 = vld [vmem:[%s4047_s3 + $0x40] sm:$0xff] }
   0xc   :  { %2873 = vmatpush.msra.mxu2 %v2982_v9  ;;  %2875 = vmatpush.msra.mxu3 %v186_v35  ;;  %v204_v51 = vand.u32 4294901760, %v203_v38  ;;  %v80_v52 = vsel %vm60_vm0, %v57_v41, 0  ;;  %v65_v53 = vsel %vm60_vm0, %v52_v42, 0  ;;  %v210_v58 = vand.u32 4294901760, %v209_v40 }
   0xd   :  { %187 = vmatpush.msra.mxu1 %v186_v35  ;;  %104 = vmatpush.msra.mxu0 %v2982_v9  ;;  %v143_v50 = vand.u32 4294901760, %v142_v43  ;;  %v3086_v55 = vsub.f32 %v62_v46, %v3073_v48  ;;  %v3088_v56 = vand.u32 4294901760, %v80_v52  ;;  %v3090_v57 = vand.u32 4294901760, %v65_v53 }
   0xe   :  { %2874 = vmatpush.msra.mxu2 %v2997_v14  ;;  %2876 = vmatpush.msra.mxu3 %v192_v39  ;;  %v150_v59 = vsub.f32 %v3040_v33, %v149_v45  ;;  %v68_v60 = vsel %vm60_vm0, %v53_v49, 0  ;;  %v83_v2 = vsel %vm60_vm0, %v58_v54, 0  ;;  %v216_v4 = vand.u32 4294901760, %v215_v47  ;;  %v3192_v49 = vld [vmem:[%s4047_s3 + $0x30] sm:$0xff] }
   0xf   :  { %193 = vmatpush.msra.mxu1 %v192_v39  ;;  %144 = vmatmul.f32.vlgmr.msra.gmra.mxu2 %v143_v50  ;;  %v109_v62 = vand.u32 4294901760, %v3086_v55  ;;  %v3102_v63 = vsub.f32 %v80_v52, %v3088_v56  ;;  %v3105_v0 = vsub.f32 %v65_v53, %v3090_v57  ;;  %v3114_v11 = vand.u32 4294901760, %v68_v60 }
  0x10   :  { %263 = vmatpush.msrb.mxu2 %v2985_v10  ;;  %2877 = vmatpush.msra.mxu3 %v198_v44  ;;  %v3116_v12 = vand.u32 4294901760, %v29_v61  ;;  %v151_v13 = vand.u32 4294901760, %v150_v59  ;;  %v3119_v17 = vand.u32 4294901760, %v83_v2  ;;  %v3161_v42 = vand.u32 4294901760, %v28_v37 }
  0x11   :  { %199 = vmatpush.msra.mxu1 %v198_v44  ;;  %106 = vmatpush.msra.mxu0 %v2997_v14  ;;  %v110_v5 = vsub.f32 %v3086_v55, %v109_v62  ;;  %v117_v6 = vand.u32 4294901760, %v3105_v0  ;;  %v157_v16 = vand.u32 4294901760, %v3102_v63  ;;  %v3206_v53 = vand.u32 4294901760, %v3192_v49 }
  0x12   :  { %266 = vmatpush.msrb.mxu2 %v3000_v15  ;;  %2878 = vmatpush.msra.mxu3 %v204_v51  ;;  %v3141_v15 = vsub.f32 %v83_v2, %v3119_v17  ;;  %v3145_v35 = vsub.f32 %v29_v61, %v3116_v12 }
  0x13   :  { %205 = vmatpush.msra.mxu1 %v204_v51  ;;  %404 = vmatpush.msrb.mxu0 %v184_v18  ;;  %v111_v26 = vand.u32 4294901760, %v110_v5  ;;  %v118_v10 = vsub.f32 %v3105_v0, %v117_v6  ;;  %v3134_v18 = vsub.f32 %v68_v60, %v3114_v11  ;;  %v158_v34 = vsub.f32 %v3102_v63, %v157_v16 }
  0x14   :  { %269 = vmatpush.msrb.mxu2 %v3009_v20  ;;  %2879 = vmatpush.msra.mxu3 %v210_v58  ;;  %v3154_v38 = vand.u32 4294901760, %v3145_v35  ;;  %v165_v44 = vand.u32 4294901760, %v3141_v15 }
  0x15   :  { %211 = vmatpush.msra.mxu1 %v210_v58  ;;  %408 = vmatpush.msrb.mxu0 %v190_v22  ;;  %v71_v22 = vsel %vm60_vm0, %v54_v30, 0  ;;  %v119_v39 = vand.u32 4294901760, %v118_v10  ;;  %v125_v40 = vand.u32 4294901760, %v3134_v18  ;;  %v159_v43 = vand.u32 4294901760, %v158_v34 }
  0x16   :  { %272 = vmatpush.msrb.mxu2 %v3012_v21  ;;  %2880 = vmatpush.msra.mxu3 %v216_v4  ;;  %v3159_v41 = vand.u32 4294901760, %v71_v22  ;;  %v577_v46 = vsub.f32 %v3145_v35, %v3154_v38 }
  0x17   :  { %235 = vmatmul.f32.vlgmr.msra.gmra.mxu3 %v3006_v19  ;;  %112 = vmatmul.f32.vlgmr.msra.gmra.mxu0 %v111_v26  ;;  %v126_v47 = vsub.f32 %v3134_v18, %v125_v40 }
  0x18   :  { %152 = vmatmul.f32.gmra.mxu2 %v151_v13  ;;  %331 = vmatpush.msrb.mxu3 %v2961_v1  ;;  %v3181_v20 = vsub.f32 %v71_v22, %v3159_v41 }
  0x19   :  { %217 = vmatpush.msra.mxu1 %v216_v4  ;;  %275 = vmatpush.msrb.mxu2 %v3017_v23  ;;  %v127_v51 = vand.u32 4294901760, %v126_v47 }
  0x1a   :  { %333 = vmatpush.msrb.mxu3 %v2966_v3  ;;  %219 = vmatmul.f32.vlgmr.msra.gmra.mxu1 %v3073_v48  ;;  %v133_v52 = vand.u32 4294901760, %v3181_v20 }
  0x1b   :  { %278 = vmatpush.msrb.mxu2 %v3020_v24  ;;  %469 = vmatpush.msrb.mxu1 %v2961_v1  ;;  %v27_v1 = vld [vmem:[%s4047_s3 + $0x38] sm:$0xff] }
  0x1c   :  { %335 = vmatpush.msrb.mxu3 %v2978_v7  ;;  %412 = vmatpush.msrb.mxu0 %v196_v28  ;;  %v3183_v28 = vand.u32 4294901760, %v577_v46  ;;  %v3197_v50 = vand.u32 4294901760, %v27_v1 }
  0x1d   :  { %546 = vmatpush.msra.mxu2 %v3116_v12  ;;  %471 = vmatpush.msrb.mxu1 %v2966_v3  ;;  %v166_v3 = vsub.f32 %v3141_v15, %v165_v44 }
  0x1e   :  { %337 = vmatpush.msrb.mxu3 %v2980_v8  ;;  %416 = vmatpush.msrb.mxu0 %v202_v29  ;;  %v3247_v29 = vsub.f32 %v27_v1, %v3197_v50 }
  0x1f   :  { %548 = vmatpush.msra.mxu2 %v3161_v42  ;;  %239 = vmatmul.f32.gmra.mxu3 %v3022_v25  ;;  %v167_v21 = vand.u32 4294901760, %v166_v3 }
  0x20   :  { %120 = vmatmul.f32.gmra.mxu0 %v119_v39  ;;  %160 = vmatmul.f32.gmra.mxu2 %v159_v43  ;;  %v3399_v43 = vld [vmem:[%s4047_s3 + $0x50] ss:$0 sm:$0xff] }
  0x21   :  { %339 = vmatpush.msrb.mxu3 %v2982_v9  ;;  %473 = vmatpush.msrb.mxu1 %v2978_v7  ;;  %v134_v7 = vsub.f32 %v3181_v20, %v133_v52 }
  0x22   :  { %223 = vmatmul.f32.gmra.mxu1 %v3090_v57  ;;  %420 = vmatpush.msrb.mxu0 %v208_v31  ;;  %v3251_v31 = vand.u32 4294901760, %v3247_v29 }
  0x23   :  { %341 = vmatpush.msrb.mxu3 %v2997_v14  ;;  %475 = vmatpush.msrb.mxu1 %v2980_v8  ;;  %v3220_v8 = vsub.f32 %v28_v37, %v3161_v42  ;;  %v135_v23 = vand.u32 4294901760, %v134_v7 }
  0x24   :  { %550 = vmatpush.msra.mxu2 %v3197_v50  ;;  %424 = vmatpush.msrb.mxu0 %v214_v32  ;;  %v589_v32 = vsub.f32 %v3247_v29, %v3251_v31 }
  0x25   :  { %579 = vmatpush.msra.mxu3 %v3183_v28  ;;  %477 = vmatpush.msrb.mxu1 %v2982_v9  ;;  %v3226_v9 = vand.u32 4294901760, %v3220_v8 }
  0x26   :  { %552 = vmatpush.msra.mxu2 %v3206_v53  ;;  %1131 = vmatpush.msra.mxu0 %v3154_v38  ;;  %v3259_v54 = vand.u32 4294901760, %v589_v32 }
  0x27   :  { %243 = vmatmul.f32.gmra.mxu3 %v3088_v56  ;;  %479 = vmatpush.msrb.mxu1 %v2997_v14  ;;  %v583_v24 = vsub.f32 %v3220_v8, %v3226_v9 }
  0x28   :  { %128 = vmatmul.f32.gmra.mxu0 %v127_v51  ;;  %168 = vmatmul.f32.gmra.mxu2 %v167_v21 }
  0x29   :  { %1162 = vmatpush.msra.mxu1 %v3116_v12  ;;  %1135 = vmatpush.msra.mxu0 %v3226_v9  ;;  %v3233_v14 = vand.u32 4294901760, %v583_v24 }
  0x2a   :  { %227 = vmatmul.f32.gmra.mxu1 %v3114_v11 }
  0x2b   :  { %1164 = vmatpush.msra.mxu1 %v3161_v42  ;;  %585 = vmatpush.msra.mxu3 %v3233_v14 }
  0x2c   :  { %1139 = vmatpush.msra.mxu0 %v3251_v31 }
  0x2d   :  { %1166 = vmatpush.msra.mxu1 %v3197_v50  ;;  %591 = vmatpush.msra.mxu3 %v3259_v54 }
  0x2f   :  { %247 = vmatmul.f32.gmra.mxu3 %v3119_v17  ;;  %1168 = vmatpush.msra.mxu1 %v3206_v53 }
  0x30   :  { %136 = vmatmul.f32.gmra.mxu0 %v135_v23  ;;  %281 = vmatmul.f32.vlgmr.msrb.gmra.mxu2 %v3086_v55 }
  0x31   :  { %617 = vmatpush.msrb.mxu2 %v3145_v35 }
  0x32   :  { %231 = vmatmul.f32.gmra.mxu1 %v3159_v41 }
  0x33   :  { %620 = vmatpush.msrb.mxu2 %v3220_v8 }
  0x35   :  { %623 = vmatpush.msrb.mxu2 %v3247_v29 }
  0x37   :  { %345 = vmatmul.f32.vlgmr.msrb.gmra.mxu3 %v109_v62 }
  0x38   :  { %426 = vmatmul.f32.vlgmr.msrb.gmra.mxu0 %v3073_v48  ;;  %286 = vmatmul.f32.gmra.mxu2 %v3105_v0 }
  0x3a   :  { %481 = vmatmul.f32.vlgmr.msrb.gmra.mxu1 %v3073_v48  ;;  %v3275_v48 = vsub.f32 %v3192_v49, %v3206_v53 }
  0x3b   :  { %1332 = vmatpush.msrb.mxu1 %v3116_v12 }
  0x3c   :  { %v3279_v55 = vand.u32 4294901760, %v3275_v48  ;;  %626 = vmatpush.msrb.mxu2 %v3275_v48 }
  0x3d   :  { %1334 = vmatpush.msrb.mxu1 %v3161_v42 }
  0x3e   :  { %1143 = vmatpush.msra.mxu0 %v3279_v55 }
  0x3f   :  { %351 = vmatmul.f32.gmra.mxu3 %v117_v6  ;;  %1336 = vmatpush.msrb.mxu1 %v3197_v50 }
  0x40   :  { %430 = vmatmul.f32.gmra.mxu0 %v3090_v57  ;;  %291 = vmatmul.f32.gmra.mxu2 %v3134_v18 }
  0x41   :  { %1338 = vmatpush.msrb.mxu1 %v3206_v53  ;;  %1303 = vmatpush.msrb.mxu0 %v3145_v35 }
  0x42   :  { %485 = vmatmul.f32.gmra.mxu1 %v3090_v57  ;;  %v595_v57 = vsub.f32 %v3275_v48, %v3279_v55 }
  0x43   :  { %1306 = vmatpush.msrb.mxu0 %v3220_v8 }
  0x44   :  { %v3286_v58 = vand.u32 4294901760, %v595_v57 }
  0x45   :  { %1309 = vmatpush.msrb.mxu0 %v3247_v29 }
  0x46   :  { %597 = vmatpush.msra.mxu3 %v3286_v58 }
  0x47   :  { %357 = vmatmul.f32.gmra.mxu3 %v125_v40  ;;  %1312 = vmatpush.msrb.mxu0 %v3275_v48 }
  0x48   :  { %434 = vmatmul.f32.gmra.mxu0 %v3114_v11  ;;  %296 = vmatmul.f32.gmra.mxu2 %v3181_v20 }
  0x49   :  { %646 = vmatpush.msrb.mxu3 %v3116_v12 }
  0x4a   :  { %489 = vmatmul.f32.gmra.mxu1 %v3114_v11 }
  0x4b   :  { %648 = vmatpush.msrb.mxu3 %v3161_v42 }
  0x4d   :  { %650 = vmatpush.msrb.mxu3 %v3197_v50 }
  0x4f   :  { %363 = vmatmul.f32.gmra.mxu3 %v133_v52 }
  0x50   :  { %438 = vmatmul.f32.gmra.mxu0 %v3159_v41  ;;  %301 = vmatmul.f32.gmra.mxu2 %v3029_v27 }
  0x51   :  { %652 = vmatpush.msrb.mxu3 %v3206_v53 }
  0x52   :  { %493 = vmatmul.f32.gmra.mxu1 %v3159_v41 }
  0x57   :  { %369 = vmatmul.f32.gmra.mxu3 %v141_v36 }
  0x58   :  { %442 = vmatmul.f32.gmra.mxu0 %v3006_v19  ;;  %306 = vmatmul.f32.gmra.mxu2 %v3040_v33 }
  0x5a   :  { %497 = vmatmul.f32.gmra.mxu1 %v3006_v19  ;;  %v2924_v19 = vmov 0.0  }
  0x5f   :  { %375 = vmatmul.f32.gmra.mxu3 %v149_v45 }
  0x60   :  { %446 = vmatmul.f32.gmra.mxu0 %v3022_v25  ;;  %311 = vmatmul.f32.gmra.mxu2 %v3102_v63 }
  0x62   :  { %501 = vmatmul.f32.gmra.mxu1 %v3022_v25 }
  0x67   :  { %381 = vmatmul.f32.gmra.mxu3 %v157_v16 }
  0x68   :  { %450 = vmatmul.f32.gmra.mxu0 %v3088_v56  ;;  %316 = vmatmul.f32.gmra.mxu2 %v3141_v15 }
  0x6a   :  { %505 = vmatmul.f32.gmra.mxu1 %v3088_v56 }
  0x6f   :  { %387 = vmatmul.f32.gmra.mxu3 %v165_v44 }
  0x70   :  { %454 = vmatmul.f32.gmra.mxu0 %v3119_v17  ;;  %558 = vmatmul.f32.vlgmr.msra.gmra.mxu2 %v2924_v19 }
  0x71   :  { %675 = vmatpush.msra.mxu2 %v3154_v38 }
  0x72   :  { %509 = vmatmul.f32.gmra.mxu1 %v3119_v17 }
  0x73   :  { %679 = vmatpush.msra.mxu2 %v3226_v9 }
  0x75   :  { %683 = vmatpush.msra.mxu2 %v3251_v31 }
  0x77   :  { %599 = vmatmul.f32.vlgmr.msra.gmra.mxu3 %v2924_v19  ;;  %687 = vmatpush.msra.mxu2 %v3279_v55 }
  0x78   :  { %629 = vmatmul.f32.vlgmr.msrb.gmra.mxu2 %v2924_v19  ;;  %706 = vmatpush.msra.mxu3 %v3116_v12 }
  0x79   :  { %772 = vmatpush.msrb.mxu2 %v3116_v12 }
  0x7a   :  { %708 = vmatpush.msra.mxu3 %v3161_v42 }
  0x7b   :  { %774 = vmatpush.msrb.mxu2 %v3161_v42 }
  0x7c   :  { %710 = vmatpush.msra.mxu3 %v3197_v50 }
  0x7d   :  { %776 = vmatpush.msrb.mxu2 %v3197_v50 }
  0x7e   :  { %712 = vmatpush.msra.mxu3 %v3206_v53 }
  0x7f   :  { %656 = vmatmul.f32.vlgmr.msrb.gmra.mxu3 %v2924_v19  ;;  %778 = vmatpush.msrb.mxu2 %v3206_v53 }
  0x80   :  { %689 = vmatmul.f32.vlgmr.msra.gmra.mxu2 %v2924_v19  ;;  %805 = vmatpush.msrb.mxu3 %v3183_v28 }
  0x81   :  { %843 = vmatpush.msra.mxu2 %v3145_v35 }
  0x82   :  { %811 = vmatpush.msrb.mxu3 %v3233_v14 }
  0x83   :  { %846 = vmatpush.msra.mxu2 %v3220_v8 }
  0x84   :  { %817 = vmatpush.msrb.mxu3 %v3259_v54 }
  0x85   :  { %849 = vmatpush.msra.mxu2 %v3247_v29 }
  0x86   :  { %823 = vmatpush.msrb.mxu3 %v3286_v58 }
  0x87   :  { %714 = vmatmul.f32.vlgmr.msra.gmra.mxu3 %v2924_v19  ;;  %852 = vmatpush.msra.mxu2 %v3275_v48 }
  0x88   :  { %872 = vmatpush.msra.mxu3 %v3116_v12 }
  0x8a   :  { %874 = vmatpush.msra.mxu3 %v3161_v42 }
  0x8c   :  { %876 = vmatpush.msra.mxu3 %v3197_v50 }
  0x8e   :  { %878 = vmatpush.msra.mxu3 %v3206_v53 }
  0x92   :  { %v3344_v25 = vpop.f32.mrf.mxu2 }
  0x94   :  { %v113_v17 = vpop.f32.mrf.mxu0 }
  0x95   :  { %v114_v44 = vadd.f32 %v3399_v43, %v113_v17 }
  0x97   :  { %v220_v26 = vpop.f32.mrf.mxu1 }
  0x98   :  { %v221_v47 = vadd.f32 %v220_v26, %v114_v44  ;;  %v3409_v26 = vld [vmem:[%s4047_s3 + $0x58] ss:$0 sm:$0xff] }
  0x9a   :  { %v3346_v27 = vpop.f32.mrf.mxu3 }
  0x9b   :  { %v3348_v33 = vpop.f32.mrf.mxu2 }
  0x9d   :  { %v3382_v18 = vpop.f32.mrf.mxu0 }
  0x9f   :  { %v3384_v34 = vpop.f32.mrf.mxu1 }
  0xa2   :  { %v3350_v36 = vpop.f32.mrf.mxu3 }
  0xa3   :  { %v3352_v45 = vpop.f32.mrf.mxu2 }
  0xa5   :  { %v3390_v37 = vpop.f32.mrf.mxu0 }
  0xa7   :  { %v3394_v41 = vpop.f32.mrf.mxu1 }
  0xaa   :  { %v3354_v56 = vpop.f32.mrf.mxu3 }
  0xab   :  { %v3356_v59 = vpop.f32.mrf.mxu2 }
  0xac   :  { %4056 = vst [vmem:[#allocation3_spill] sm:$0xff] %v3356_v59 }
  0xad   :  { %v3402_v46 = vpop.f32.mrf.mxu0 }
  0xaf   :  { %v3404_v3 = vpop.f32.mrf.mxu1 }
  0xb2   :  { %v3358_v60 = vpop.f32.mrf.mxu3 }
  0xb3   :  { %4057 = vst [vmem:[#allocation4_spill] sm:$0xff] %v3358_v60  ;;  %v282_v61 = vpop.f32.mrf.mxu2 }
  0xb4   :  { %v283_v49 = vadd.f32 %v282_v61, %v221_v47  ;;  %v3414_v61 = vld [vmem:[%s4047_s3 + $0x60] ss:$0 sm:$0xff] }
  0xb5   :  { %v427_v23 = vpop.f32.mrf.mxu0 }
  0xb7   :  { %v482_v19 = vpop.f32.mrf.mxu1 }
  0xba   :  { %v346_v62 = vpop.f32.mrf.mxu3 }
  0xbb   :  { %v3360_v63 = vpop.f32.mrf.mxu2  ;;  %v347_v21 = vadd.f32 %v346_v62, %v283_v49 }
  0xbd   :  { %v428_v57 = vadd.f32 %v427_v23, %v347_v21 }
  0xbf   :  { %v483_v17 = vadd.f32 %v482_v19, %v428_v57 }
  0xc2   :  { %v3362_v0 = vpop.f32.mrf.mxu3 }
  0xc3   :  { %v3364_v2 = vpop.f32.mrf.mxu2 }
  0xca   :  { %v3366_v4 = vpop.f32.mrf.mxu3 }
  0xcb   :  { %v3368_v5 = vpop.f32.mrf.mxu2 }
  0xd2   :  { %v3370_v6 = vpop.f32.mrf.mxu3 }
  0xd3   :  { %v3372_v11 = vpop.f32.mrf.mxu2 }
  0xda   :  { %v3374_v13 = vpop.f32.mrf.mxu3 }
  0xdb   :  { %v3376_v16 = vpop.f32.mrf.mxu2 }
  0xe2   :  { %v3378_v30 = vpop.f32.mrf.mxu3 }
  0xe3   :  { %v3380_v10 = vpop.f32.mrf.mxu2 }
  0xe4   :  { %4058 = vst [vmem:[#allocation5_spill] sm:$0xff] %v3380_v10 }
  0xea   :  { %v3386_v15 = vpop.f32.mrf.mxu3 }
  0xeb   :  { %4059 = vst [vmem:[#allocation6_spill] sm:$0xff] %v3386_v15  ;;  %v3388_v22 = vpop.f32.mrf.mxu2 }
  0xec   :  { %4060 = vst [vmem:[#allocation7_spill] sm:$0xff] %v3388_v22 }
  0xf2   :  { %v3392_v39 = vpop.f32.mrf.mxu3 }
  0xf3   :  { %4061 = vst [vmem:[#allocation8_spill] sm:$0xff] %v3392_v39  ;;  %v559_v40 = vpop.f32.mrf.mxu2 }
  0xfa   :  { %v600_v1 = vpop.f32.mrf.mxu3 }
  0xfb   :  { %v630_v20 = vpop.f32.mrf.mxu2  ;;  %v601_v51 = vadd.f32 %v600_v1, %v559_v40 }
  0xfd   :  { %v631_v7 = vadd.f32 %v630_v20, %v601_v51  ;;  %v35_v20 = vld [vmem:[%s4049_s1] sm:$0xff] }
  0xfe   :  { %vm43_vm1 = vcmp.gt.f32.partialorder %v35_v20, 0.5 }
 0x102   :  { %v657_v52 = vpop.f32.mrf.mxu3 }
 0x103   :  { %v658_v24 = vadd.f32 %v657_v52, %v631_v7  ;;  %v690_v32 = vpop.f32.mrf.mxu2 }
 0x105   :  { %v691_v39 = vadd.f32 %v690_v32, %v658_v24 }
 0x10a   :  { %v715_v22 = vpop.f32.mrf.mxu3 }
 0x10b   :  { %v716_v60 = vadd.f32 %v715_v22, %v691_v39 }
 0x10d   :  { %v718_v59 = vadd.f32 %v716_v60, %v483_v17 }
 0x10f   :  { %2889 = vtanh.f32 %v718_v59 }
 0x115   :  { %v2890_v62 = vpop.eup %2889 }
 0x116   :  { %v720_v40 = vmul.f32 %v2890_v62, %v3409_v26 }
 0x118   :  { %v721_v44 = vadd.f32 %v3414_v61, %v720_v40 }
 0x11a   :  { %724 = vrot.lane.b32.xlu0 %v721_v44, %s2925_s9  ;;  %v722_v22 = vmul.f32 0.0, %v721_v44 }
 0x18c   :  { %v725_v60 = vpop.permute.xlu0 %724 }
 0x18d   :  { %v727_v59 = vmul.f32 %v725_v60, %v721_v44 }
 0x18f   :  { %729 = vrot.lane.b32.xlu0 %v727_v59, %s2925_s9 }
 0x201   :  { %v730_v39 = vpop.permute.xlu0 %729 }
 0x202   :  { %v732_v1 = vadd.f32 %v730_v39, %v722_v22 }
 0x204   :  { %2891 = vtanh.f32 %v732_v1  ;;  %745 = vrot.lane.b32.xlu2 %v732_v1, %s2926_s10 }
 0x20a   :  { %v2892_v47 = vpop.eup %2891 }
 0x20b   :  { %735 = vrot.lane.b32.xlu1 %v2892_v47, %s2925_s9 }
 0x25e   :  { %v746_v49 = vpop.permute.xlu2 %745 }
 0x25f   :  { %v3425_v51 = vsel %vm43_vm1, %v746_v49, 0.0 }
 0x260   :  { %949 = vrot.lane.b32.xlu0 %v3425_v51, %s2925_s9 }
 0x27d   :  { %v736_v52 = vpop.permute.xlu1 %735 }
 0x27e   :  { %v738_v21 = vmul.f32 %v736_v52, %v721_v44  ;;  %v122_v44 = vadd.f32 %v3399_v43, %v3382_v18  ;;  %v431_v52 = vpop.f32.mrf.mxu0 }
 0x280   :  { %740 = vrot.lane.b32.xlu1 %v738_v21, %s2927_s13  ;;  %v225_v59 = vadd.f32 %v3384_v34, %v122_v44 }
 0x282   :  { %v288_v22 = vadd.f32 %v3360_v63, %v225_v59 }
 0x284   :  { %v353_v20 = vadd.f32 %v3362_v0, %v288_v22 }
 0x286   :  { %v432_v21 = vadd.f32 %v431_v52, %v353_v20 }
 0x2f2   :  { %v741_v7 = vpop.permute.xlu1 %740 }
 0x2f3   :  { %v3430_v23 = vsel %vm43_vm1, %v741_v7, 0.0 }
 0x2f4   :  { %4062 = vst [vmem:[#allocation9_spill] sm:$0xff] %v3430_v23  ;;  %v757_v24 = vsel %vm521_vm2, %v3430_v23, 0 }
 0x2f5   :  { %v779_v32 = vand.u32 4294901760, %v757_v24 }
 0x2f7   :  { %v780_v57 = vsub.f32 %v757_v24, %v779_v32  ;;  %825 = vmatmul.f32.vlgmr.msrb.gmra.mxu3 %v779_v32  ;;  %v486_v24 = vpop.f32.mrf.mxu1 }
 0x2f8   :  { %932 = vmatpush.msrb.mxu3 %v3116_v12 }
 0x2f9   :  { %v781_v19 = vand.u32 4294901760, %v780_v57 }
 0x2fa   :  { %934 = vmatpush.msrb.mxu3 %v3161_v42 }
 0x2fb   :  { %v782_v17 = vsub.f32 %v780_v57, %v781_v19 }
 0x2fc   :  { %936 = vmatpush.msrb.mxu3 %v3197_v50 }
 0x2fd   :  { %v783_v62 = vand.u32 4294901760, %v782_v17  ;;  %v487_v17 = vadd.f32 %v486_v24, %v432_v21 }
 0x2fe   :  { %938 = vmatpush.msrb.mxu3 %v3206_v53 }
 0x2ff   :  { %784 = vmatmul.f32.vlgmr.msrb.gmra.mxu2 %v783_v62  ;;  %882 = vmatmul.f32.vlgmr.msra.gmra.mxu3 %v781_v19 }
 0x300   :  { %901 = vmatpush.msrb.mxu2 %v3154_v38  ;;  %1035 = vmatpush.msra.mxu3 %v3183_v28 }
 0x302   :  { %905 = vmatpush.msrb.mxu2 %v3226_v9  ;;  %1041 = vmatpush.msra.mxu3 %v3233_v14 }
 0x304   :  { %909 = vmatpush.msrb.mxu2 %v3251_v31  ;;  %1047 = vmatpush.msra.mxu3 %v3259_v54 }
 0x306   :  { %913 = vmatpush.msrb.mxu2 %v3279_v55  ;;  %1053 = vmatpush.msra.mxu3 %v3286_v58 }
 0x307   :  { %855 = vmatmul.f32.vlgmr.msra.gmra.mxu2 %v780_v57  ;;  %940 = vmatmul.f32.vlgmr.msrb.gmra.mxu3 %v779_v32 }
 0x308   :  { %1002 = vmatpush.msra.mxu2 %v3116_v12  ;;  %1102 = vmatpush.msrb.mxu3 %v3116_v12 }
 0x30a   :  { %1004 = vmatpush.msra.mxu2 %v3161_v42  ;;  %1104 = vmatpush.msrb.mxu3 %v3161_v42 }
 0x30c   :  { %1006 = vmatpush.msra.mxu2 %v3197_v50  ;;  %1106 = vmatpush.msrb.mxu3 %v3197_v50 }
 0x30e   :  { %1008 = vmatpush.msra.mxu2 %v3206_v53  ;;  %1108 = vmatpush.msrb.mxu3 %v3206_v53 }
 0x30f   :  { %915 = vmatmul.f32.vlgmr.msrb.gmra.mxu2 %v779_v32 }
 0x310   :  { %1073 = vmatpush.msrb.mxu2 %v3145_v35 }
 0x312   :  { %1076 = vmatpush.msrb.mxu2 %v3220_v8 }
 0x314   :  { %1079 = vmatpush.msrb.mxu2 %v3247_v29 }
 0x316   :  { %1082 = vmatpush.msrb.mxu2 %v3275_v48 }
 0x37a   :  { %v826_v40 = vpop.f32.mrf.mxu3 }
 0x382   :  { %v785_v60 = vpop.f32.mrf.mxu2  ;;  %v883_v39 = vpop.f32.mrf.mxu3 }
 0x383   :  { %v827_v47 = vadd.f32 %v826_v40, %v785_v60  ;;  %v950_v60 = vpop.permute.xlu0 %949 }
 0x38a   :  { %v856_v1 = vpop.f32.mrf.mxu2  ;;  %v941_v19 = vpop.f32.mrf.mxu3 }
 0x38b   :  { %v857_v49 = vadd.f32 %v856_v1, %v827_v47 }
 0x38d   :  { %v884_v7 = vadd.f32 %v883_v39, %v857_v49  ;;  %v3473_v49 = vld [vmem:[%s4049_s1 + $0x8] sm:$0xff] }
 0x38e   :  { %4063 = vst [vmem:[#allocation10_spill] sm:$0xff] %v3473_v49  ;;  %vm44_vm3 = vcmp.gt.f32.partialorder %v3473_v49, 0.5 }
 0x392   :  { %v916_v32 = vpop.f32.mrf.mxu2 }
 0x393   :  { %v917_v57 = vadd.f32 %v916_v32, %v884_v7 }
 0x395   :  { %v942_v18 = vadd.f32 %v941_v19, %v917_v57 }
 0x397   :  { %v944_v62 = vadd.f32 %v942_v18, %v487_v17 }
 0x399   :  { %2893 = vtanh.f32 %v944_v62  ;;  %v435_v62 = vpop.f32.mrf.mxu0 }
 0x39f   :  { %v2894_v34 = vpop.eup %2893 }
 0x3a0   :  { %v946_v63 = vmul.f32 %v2894_v34, %v3409_v26  ;;  %v490_v34 = vpop.f32.mrf.mxu1 }
 0x3a2   :  { %v947_v44 = vadd.f32 %v3414_v61, %v946_v63  ;;  %v3517_v63 = vpop.f32.mrf.mxu0 }
 0x3a4   :  { %954 = vrot.lane.b32.xlu2 %v947_v44, %s2925_s9  ;;  %v952_v59 = vmul.f32 %v950_v60, %v947_v44 }
 0x3fe   :  { %v955_v0 = vpop.permute.xlu2 %954 }
 0x3ff   :  { %v957_v40 = vmul.f32 %v955_v0, %v947_v44  ;;  %v3521_v0 = vpop.f32.mrf.mxu0 }
 0x401   :  { %959 = vrot.lane.b32.xlu1 %v957_v40, %s2925_s9 }
 0x407   :  { %v3525_v60 = vpop.f32.mrf.mxu0 }
 0x473   :  { %v960_v22 = vpop.permute.xlu1 %959 }
 0x474   :  { %v962_v39 = vadd.f32 %v960_v22, %v952_v59  ;;  %v3529_v22 = vpop.f32.mrf.mxu0 }
 0x475   :  { %4065 = vst [vmem:[#allocation12_spill] sm:$0xff] %v3529_v22 }
 0x476   :  { %2895 = vtanh.f32 %v962_v39  ;;  %975 = vrot.lane.b32.xlu1 %v962_v39, %s2926_s10  ;;  %v130_v39 = vadd.f32 %v3399_v43, %v3390_v37 }
 0x47c   :  { %v2896_v1 = vpop.eup %2895 }
 0x47d   :  { %965 = vrot.lane.b32.xlu2 %v2896_v1, %s2925_s9 }
 0x4d7   :  { %v966_v47 = vpop.permute.xlu2 %965 }
 0x4d8   :  { %v968_v20 = vmul.f32 %v966_v47, %v947_v44  ;;  %v3519_v44 = vpop.f32.mrf.mxu1  ;;  %v229_v47 = vadd.f32 %v3394_v41, %v130_v39 }
 0x4da   :  { %970 = vrot.lane.b32.xlu0 %v968_v20, %s2927_s13 }
 0x4e0   :  { %v3523_v40 = vpop.f32.mrf.mxu1 }
 0x4e8   :  { %v976_v52 = vpop.permute.xlu1 %975  ;;  %v3527_v59 = vpop.f32.mrf.mxu1 }
 0x4e9   :  { %v3479_v21 = vsel %vm44_vm3, %v976_v52, %v3425_v51 }
 0x4ea   :  { %1179 = vrot.lane.b32.xlu0 %v3479_v21, %s2925_s9 }
 0x4f0   :  { %v3533_v1 = vpop.f32.mrf.mxu1 }
 0x4f1   :  { %4066 = vst [vmem:[#allocation13_spill] sm:$0xff] %v3533_v1 }
 0x54c   :  { %v3483_v7 = vpop.permute.xlu0 %970 }
 0x54d   :  { %4064 = vst [vmem:[#allocation11_spill] sm:$0xff] %v3483_v7  ;;  %v3489_v24 = vsel %vm44_vm3, %v3483_v7, %v3430_v23 }
 0x54e   :  { %v987_v32 = vsel %vm521_vm2, %v3489_v24, 0 }
 0x54f   :  { %v1009_v57 = vand.u32 4294901760, %v987_v32 }
 0x551   :  { %v1010_v19 = vsub.f32 %v987_v32, %v1009_v57  ;;  %1055 = vmatmul.f32.vlgmr.msra.gmra.mxu3 %v1009_v57  ;;  %1145 = vmatmul.f32.vlgmr.msra.gmra.mxu0 %v1009_v57  ;;  %v293_v32 = vadd.f32 %v3364_v2, %v229_v47 }
 0x552   :  { %1170 = vmatmul.f32.vlgmr.msra.gmra.mxu1 %v1009_v57  ;;  %1265 = vmatpush.msra.mxu3 %v3183_v28  ;;  %v3537_v57 = vpop.f32.mrf.mxu0 }
 0x553   :  { %v1011_v51 = vand.u32 4294901760, %v1010_v19  ;;  %1495 = vmatpush.msra.mxu1 %v3183_v28  ;;  %1462 = vmatpush.msra.mxu0 %v3116_v12 }
 0x554   :  { %1271 = vmatpush.msra.mxu3 %v3233_v14 }
 0x555   :  { %v1012_v17 = vsub.f32 %v1010_v19, %v1011_v51  ;;  %1501 = vmatpush.msra.mxu1 %v3233_v14  ;;  %1464 = vmatpush.msra.mxu0 %v3161_v42 }
 0x556   :  { %1277 = vmatpush.msra.mxu3 %v3259_v54 }
 0x557   :  { %v1013_v18 = vand.u32 4294901760, %v1012_v17  ;;  %1507 = vmatpush.msra.mxu1 %v3259_v54  ;;  %1466 = vmatpush.msra.mxu0 %v3197_v50 }
 0x558   :  { %1283 = vmatpush.msra.mxu3 %v3286_v58 }
 0x559   :  { %1014 = vmatmul.f32.vlgmr.msra.gmra.mxu2 %v1013_v18  ;;  %1112 = vmatmul.f32.vlgmr.msrb.gmra.mxu3 %v1011_v51  ;;  %v359_v51 = vadd.f32 %v3366_v4, %v293_v32 }
 0x55a   :  { %1232 = vmatpush.msra.mxu2 %v3116_v12  ;;  %1392 = vmatpush.msrb.mxu3 %v3116_v12 }
 0x55b   :  { %1513 = vmatpush.msra.mxu1 %v3286_v58  ;;  %1468 = vmatpush.msra.mxu0 %v3206_v53  ;;  %v436_v23 = vadd.f32 %v435_v62, %v359_v51 }
 0x55c   :  { %1234 = vmatpush.msra.mxu2 %v3161_v42  ;;  %1394 = vmatpush.msrb.mxu3 %v3161_v42  ;;  %v1180_v62 = vpop.permute.xlu0 %1179 }
 0x55d   :  { %v491_v41 = vadd.f32 %v490_v34, %v436_v23  ;;  %v3552_v34 = vld [vmem:[%s4049_s1 + $0x10] sm:$0xff] }
 0x55e   :  { %1236 = vmatpush.msra.mxu2 %v3197_v50  ;;  %1396 = vmatpush.msrb.mxu3 %v3197_v50  ;;  %vm45_vm4 = vcmp.gt.f32.partialorder %v3552_v34, 0.5 }
 0x560   :  { %1238 = vmatpush.msra.mxu2 %v3206_v53  ;;  %1398 = vmatpush.msrb.mxu3 %v3206_v53 }
 0x561   :  { %1085 = vmatmul.f32.vlgmr.msrb.gmra.mxu2 %v1010_v19  ;;  %v3539_v19 = vpop.f32.mrf.mxu1 }
 0x562   :  { %1361 = vmatpush.msrb.mxu2 %v3154_v38  ;;  %4067 = vst [vmem:[#allocation14_spill] sm:$0xff] %v3539_v19 }
 0x564   :  { %1365 = vmatpush.msrb.mxu2 %v3226_v9 }
 0x566   :  { %1369 = vmatpush.msrb.mxu2 %v3251_v31 }
 0x568   :  { %1373 = vmatpush.msrb.mxu2 %v3279_v55 }
 0x5ce   :  { %v1146_v22 = vpop.f32.mrf.mxu0 }
 0x5cf   :  { %v1171_v15 = vpop.f32.mrf.mxu1 }
 0x5d4   :  { %v1056_v20 = vpop.f32.mrf.mxu3 }
 0x5dc   :  { %v1015_v52 = vpop.f32.mrf.mxu2  ;;  %v1113_v7 = vpop.f32.mrf.mxu3 }
 0x5dd   :  { %v1057_v17 = vadd.f32 %v1056_v20, %v1015_v52 }
 0x5e4   :  { %v1086_v18 = vpop.f32.mrf.mxu2 }
 0x5e5   :  { %v1087_v49 = vadd.f32 %v1086_v18, %v1057_v17 }
 0x5e7   :  { %v1114_v37 = vadd.f32 %v1113_v7, %v1087_v49 }
 0x5e9   :  { %v1147_v1 = vadd.f32 %v1146_v22, %v1114_v37 }
 0x5eb   :  { %v1172_v39 = vadd.f32 %v1171_v15, %v1147_v1 }
 0x5ed   :  { %v1174_v10 = vadd.f32 %v1172_v39, %v491_v41  ;;  %v138_v41 = vadd.f32 %v3399_v43, %v3402_v46 }
 0x5ef   :  { %2897 = vtanh.f32 %v1174_v10  ;;  %v233_v39 = vadd.f32 %v3404_v3, %v138_v41 }
 0x5f5   :  { %v2898_v2 = vpop.eup %2897 }
 0x5f6   :  { %v1176_v47 = vmul.f32 %v2898_v2, %v3409_v26  ;;  %v298_v2 = vadd.f32 %v3368_v5, %v233_v39 }
 0x5f8   :  { %v1177_v19 = vadd.f32 %v3414_v61, %v1176_v47 }
 0x5fa   :  { %1184 = vrot.lane.b32.xlu2 %v1177_v19, %s2925_s9  ;;  %v1182_v49 = vmul.f32 %v1180_v62, %v1177_v19 }
 0x654   :  { %v1185_v4 = vpop.permute.xlu2 %1184 }
 0x655   :  { %v1187_v20 = vmul.f32 %v1185_v4, %v1177_v19 }
 0x657   :  { %1189 = vrot.lane.b32.xlu1 %v1187_v20, %s2925_s9 }
 0x6c9   :  { %v1190_v7 = vpop.permute.xlu1 %1189 }
 0x6ca   :  { %v1192_v22 = vadd.f32 %v1190_v7, %v1182_v49  ;;  %v365_v49 = vadd.f32 %v3370_v6, %v298_v2 }
 0x6cc   :  { %2899 = vtanh.f32 %v1192_v22  ;;  %1205 = vrot.lane.b32.xlu1 %v1192_v22, %s2926_s10 }
 0x6d2   :  { %v2900_v15 = vpop.eup %2899 }
 0x6d3   :  { %1195 = vrot.lane.b32.xlu2 %v2900_v15, %s2925_s9  ;;  %v440_v15 = vadd.f32 %v3517_v63, %v365_v49 }
 0x6d5   :  { %v495_v46 = vadd.f32 %v3519_v44, %v440_v15 }
 0x72d   :  { %v1196_v10 = vpop.permute.xlu2 %1195 }
 0x72e   :  { %v1198_v23 = vmul.f32 %v1196_v10, %v1177_v19 }
 0x730   :  { %1200 = vrot.lane.b32.xlu0 %v1198_v23, %s2927_s13 }
 0x73e   :  { %v1206_v1 = vpop.permute.xlu1 %1205 }
 0x73f   :  { %v3558_v52 = vsel %vm45_vm4, %v1206_v1, %v3479_v21 }
 0x740   :  { %1409 = vrot.lane.b32.xlu0 %v3558_v52, %s2925_s9 }
 0x7a2   :  { %v3562_v32 = vpop.permute.xlu0 %1200 }
 0x7a3   :  { %v3568_v19 = vsel %vm45_vm4, %v3562_v32, %v3489_v24 }
 0x7a4   :  { %v1217_v51 = vsel %vm521_vm2, %v3568_v19, 0 }
 0x7a5   :  { %v1239_v17 = vand.u32 4294901760, %v1217_v51 }
 0x7a7   :  { %v1240_v18 = vsub.f32 %v1217_v51, %v1239_v17  ;;  %1285 = vmatmul.f32.vlgmr.msra.gmra.mxu3 %v1239_v17 }
 0x7a8   :  { %1562 = vmatpush.msra.mxu3 %v3116_v12 }
 0x7a9   :  { %1315 = vmatmul.f32.vlgmr.msrb.gmra.mxu0 %v1240_v18  ;;  %v1241_v21 = vand.u32 4294901760, %v1240_v18 }
 0x7aa   :  { %1564 = vmatpush.msra.mxu3 %v3161_v42  ;;  %1591 = vmatpush.msrb.mxu0 %v3154_v38 }
 0x7ab   :  { %1342 = vmatmul.f32.vlgmr.msrb.gmra.mxu1 %v1241_v21  ;;  %v1242_v37 = vsub.f32 %v1240_v18, %v1241_v21 }
 0x7ac   :  { %1566 = vmatpush.msra.mxu3 %v3197_v50  ;;  %1622 = vmatpush.msrb.mxu1 %v3116_v12 }
 0x7ad   :  { %v1243_v24 = vand.u32 4294901760, %v1242_v37  ;;  %1595 = vmatpush.msrb.mxu0 %v3226_v9 }
 0x7ae   :  { %1568 = vmatpush.msra.mxu3 %v3206_v53  ;;  %1624 = vmatpush.msrb.mxu1 %v3161_v42 }
 0x7af   :  { %1244 = vmatmul.f32.vlgmr.msra.gmra.mxu2 %v1243_v24  ;;  %1400 = vmatmul.f32.vlgmr.msrb.gmra.mxu3 %v1239_v17 }
 0x7b0   :  { %1533 = vmatpush.msra.mxu2 %v3145_v35  ;;  %1626 = vmatpush.msrb.mxu1 %v3197_v50 }
 0x7b1   :  { %1599 = vmatpush.msrb.mxu0 %v3251_v31  ;;  %1725 = vmatpush.msrb.mxu3 %v3183_v28 }
 0x7b2   :  { %1536 = vmatpush.msra.mxu2 %v3220_v8  ;;  %1628 = vmatpush.msrb.mxu1 %v3206_v53  ;;  %v1410_v63 = vpop.permute.xlu0 %1409 }
 0x7b3   :  { %1603 = vmatpush.msrb.mxu0 %v3279_v55  ;;  %1731 = vmatpush.msrb.mxu3 %v3233_v14 }
 0x7b4   :  { %1539 = vmatpush.msra.mxu2 %v3247_v29 }
 0x7b5   :  { %1737 = vmatpush.msrb.mxu3 %v3259_v54 }
 0x7b6   :  { %1542 = vmatpush.msra.mxu2 %v3275_v48 }
 0x7b7   :  { %1375 = vmatmul.f32.vlgmr.msrb.gmra.mxu2 %v1239_v17  ;;  %1743 = vmatpush.msrb.mxu3 %v3286_v58 }
 0x7b8   :  { %1692 = vmatpush.msrb.mxu2 %v3116_v12 }
 0x7ba   :  { %1694 = vmatpush.msrb.mxu2 %v3161_v42 }
 0x7bc   :  { %1696 = vmatpush.msrb.mxu2 %v3197_v50 }
 0x7be   :  { %1698 = vmatpush.msrb.mxu2 %v3206_v53 }
 0x826   :  { %v1316_v62 = vpop.f32.mrf.mxu0 }
 0x828   :  { %v1343_v22 = vpop.f32.mrf.mxu1 }
 0x82a   :  { %v1286_v47 = vpop.f32.mrf.mxu3 }
 0x832   :  { %v1245_v4 = vpop.f32.mrf.mxu2  ;;  %v1401_v51 = vpop.f32.mrf.mxu3 }
 0x833   :  { %v1287_v20 = vadd.f32 %v1286_v47, %v1245_v4  ;;  %v3613_v4 = vld [vmem:[%s4049_s1 + $0x18] sm:$0xff] }
 0x834   :  { %vm46_vm5 = vcmp.gt.f32.partialorder %v3613_v4, 0.5  ;;  %v517_v4 = vld [vmem:[%s4050_s2 + $0x20] sm:$0xff] }
 0x835   :  { %v1317_v7 = vadd.f32 %v1316_v62, %v1287_v20  ;;  %526 = vst.msk [vmem:[#allocation2 + $0x20] sm:$0xff] %vm521_vm2, %v517_v4 }
 0x837   :  { %v1344_v10 = vadd.f32 %v1343_v22, %v1317_v7 }
 0x83a   :  { %v1376_v23 = vpop.f32.mrf.mxu2 }
 0x83b   :  { %v1377_v1 = vadd.f32 %v1376_v23, %v1344_v10 }
 0x83d   :  { %v1402_v17 = vadd.f32 %v1401_v51, %v1377_v1  ;;  %v146_v1 = vadd.f32 %v3399_v43, %v3344_v25 }
 0x83f   :  { %v1404_v3 = vadd.f32 %v1402_v17, %v495_v46  ;;  %v237_v51 = vadd.f32 %v3346_v27, %v146_v1  ;;  %v3674_v1 = vld [vmem:[%s4049_s1 + $0x20] sm:$0xff] }
 0x840   :  { %vm47_vm6 = vcmp.gt.f32.partialorder %v3674_v1, 0.5  ;;  %v2363_v1 = vld [vmem:[%s4051_s4 + $0x18] sm:$0xff] }
 0x841   :  { %2901 = vtanh.f32 %v1404_v3  ;;  %v303_v3 = vadd.f32 %v3372_v11, %v237_v51 }
 0x847   :  { %v2902_v5 = vpop.eup %2901 }
 0x848   :  { %v1406_v18 = vmul.f32 %v2902_v5, %v3409_v26 }
 0x84a   :  { %v1407_v21 = vadd.f32 %v3414_v61, %v1406_v18 }
 0x84c   :  { %1414 = vrot.lane.b32.xlu2 %v1407_v21, %s2925_s9  ;;  %v1412_v24 = vmul.f32 %v1410_v63, %v1407_v21 }
 0x8a6   :  { %v1415_v6 = vpop.permute.xlu2 %1414 }
 0x8a7   :  { %v1417_v37 = vmul.f32 %v1415_v6, %v1407_v21 }
 0x8a9   :  { %1419 = vrot.lane.b32.xlu1 %v1417_v37, %s2925_s9 }
 0x91b   :  { %v1420_v41 = vpop.permute.xlu1 %1419 }
 0x91c   :  { %v1422_v39 = vadd.f32 %v1420_v41, %v1412_v24 }
 0x91e   :  { %2903 = vtanh.f32 %v1422_v39  ;;  %1435 = vrot.lane.b32.xlu1 %v1422_v39, %s2926_s10 }
 0x924   :  { %v2904_v44 = vpop.eup %2903 }
 0x925   :  { %1425 = vrot.lane.b32.xlu2 %v2904_v44, %s2925_s9 }
 0x97f   :  { %v1426_v2 = vpop.permute.xlu2 %1425 }
 0x980   :  { %v1428_v47 = vmul.f32 %v1426_v2, %v1407_v21  ;;  %v371_v21 = vadd.f32 %v3374_v13, %v303_v3 }
 0x982   :  { %1430 = vrot.lane.b32.xlu0 %v1428_v47, %s2927_s13  ;;  %v444_v63 = vadd.f32 %v3521_v0, %v371_v21 }
 0x984   :  { %v499_v25 = vadd.f32 %v3523_v40, %v444_v63 }
 0x990   :  { %v1436_v20 = vpop.permute.xlu1 %1435 }
 0x991   :  { %v3619_v62 = vsel %vm46_vm5, %v1436_v20, %v3558_v52 }
 0x992   :  { %1639 = vrot.lane.b32.xlu0 %v3619_v62, %s2925_s9 }
 0x9f4   :  { %v3623_v49 = vpop.permute.xlu0 %1430 }
 0x9f5   :  { %v3629_v7 = vsel %vm46_vm5, %v3623_v49, %v3568_v19 }
 0x9f6   :  { %v1447_v22 = vsel %vm521_vm2, %v3629_v7, 0 }
 0x9f7   :  { %v1469_v15 = vand.u32 4294901760, %v1447_v22 }
 0x9f9   :  { %v1470_v10 = vsub.f32 %v1447_v22, %v1469_v15  ;;  %1515 = vmatmul.f32.vlgmr.msra.gmra.mxu1 %v1469_v15 }
 0x9fa   :  { %1792 = vmatpush.msra.mxu1 %v3116_v12 }
 0x9fb   :  { %1545 = vmatmul.f32.vlgmr.msra.gmra.mxu2 %v1470_v10  ;;  %v1471_v52 = vand.u32 4294901760, %v1470_v10 }
 0x9fc   :  { %1794 = vmatpush.msra.mxu1 %v3161_v42  ;;  %1821 = vmatpush.msra.mxu2 %v3154_v38 }
 0x9fd   :  { %1572 = vmatmul.f32.vlgmr.msra.gmra.mxu3 %v1471_v52  ;;  %v1472_v23 = vsub.f32 %v1470_v10, %v1471_v52 }
 0x9fe   :  { %1796 = vmatpush.msra.mxu1 %v3197_v50  ;;  %1852 = vmatpush.msra.mxu3 %v3116_v12 }
 0x9ff   :  { %v1473_v19 = vand.u32 4294901760, %v1472_v23  ;;  %1825 = vmatpush.msra.mxu2 %v3226_v9 }
 0xa00   :  { %1798 = vmatpush.msra.mxu1 %v3206_v53  ;;  %1854 = vmatpush.msra.mxu3 %v3161_v42 }
 0xa01   :  { %1474 = vmatmul.f32.vlgmr.msra.gmra.mxu0 %v1473_v19  ;;  %1630 = vmatmul.f32.vlgmr.msrb.gmra.mxu1 %v1469_v15 }
 0xa02   :  { %1763 = vmatpush.msra.mxu0 %v3145_v35  ;;  %1856 = vmatpush.msra.mxu3 %v3197_v50 }
 0xa03   :  { %1829 = vmatpush.msra.mxu2 %v3251_v31  ;;  %1955 = vmatpush.msrb.mxu1 %v3183_v28 }
 0xa04   :  { %1766 = vmatpush.msra.mxu0 %v3220_v8  ;;  %1858 = vmatpush.msra.mxu3 %v3206_v53  ;;  %v1640_v0 = vpop.permute.xlu0 %1639 }
 0xa05   :  { %1833 = vmatpush.msra.mxu2 %v3279_v55  ;;  %1961 = vmatpush.msrb.mxu1 %v3233_v14 }
 0xa06   :  { %1769 = vmatpush.msra.mxu0 %v3247_v29 }
 0xa07   :  { %1967 = vmatpush.msrb.mxu1 %v3259_v54 }
 0xa08   :  { %1772 = vmatpush.msra.mxu0 %v3275_v48 }
 0xa09   :  { %1605 = vmatmul.f32.vlgmr.msrb.gmra.mxu0 %v1469_v15  ;;  %1973 = vmatpush.msrb.mxu1 %v3286_v58 }
 0xa0a   :  { %1922 = vmatpush.msrb.mxu0 %v3116_v12 }
 0xa0c   :  { %1924 = vmatpush.msrb.mxu0 %v3161_v42 }
 0xa0e   :  { %1926 = vmatpush.msrb.mxu0 %v3197_v50 }
 0xa10   :  { %1928 = vmatpush.msrb.mxu0 %v3206_v53 }
 0xa76   :  { %v1516_v46 = vpop.f32.mrf.mxu1 }
 0xa7e   :  { %v1475_v17 = vpop.f32.mrf.mxu0  ;;  %v1546_v18 = vpop.f32.mrf.mxu2 }
 0xa7f   :  { %v1517_v5 = vadd.f32 %v1516_v46, %v1475_v17  ;;  %v1631_v44 = vpop.f32.mrf.mxu1 }
 0xa80   :  { %v1573_v37 = vpop.f32.mrf.mxu3 }
 0xa81   :  { %v1547_v6 = vadd.f32 %v1546_v18, %v1517_v5 }
 0xa83   :  { %v1574_v24 = vadd.f32 %v1573_v37, %v1547_v6 }
 0xa86   :  { %v1606_v41 = vpop.f32.mrf.mxu0 }
 0xa87   :  { %v1607_v39 = vadd.f32 %v1606_v41, %v1574_v24 }
 0xa89   :  { %v1632_v2 = vadd.f32 %v1631_v44, %v1607_v39 }
 0xa8b   :  { %v1634_v27 = vadd.f32 %v1632_v2, %v499_v25 }
 0xa8d   :  { %2905 = vtanh.f32 %v1634_v27 }
 0xa93   :  { %v2906_v47 = vpop.eup %2905 }
 0xa94   :  { %v1636_v11 = vmul.f32 %v2906_v47, %v3409_v26 }
 0xa96   :  { %v1637_v20 = vadd.f32 %v3414_v61, %v1636_v11 }
 0xa98   :  { %1644 = vrot.lane.b32.xlu2 %v1637_v20, %s2925_s9  ;;  %v1642_v15 = vmul.f32 %v1640_v0, %v1637_v20 }
 0xaf2   :  { %v1645_v13 = vpop.permute.xlu2 %1644 }
 0xaf3   :  { %v1647_v22 = vmul.f32 %v1645_v13, %v1637_v20 }
 0xaf5   :  { %1649 = vrot.lane.b32.xlu1 %v1647_v22, %s2925_s9 }
 0xb67   :  { %v1650_v10 = vpop.permute.xlu1 %1649 }
 0xb68   :  { %v1652_v52 = vadd.f32 %v1650_v10, %v1642_v15 }
 0xb6a   :  { %2907 = vtanh.f32 %v1652_v52  ;;  %1665 = vrot.lane.b32.xlu1 %v1652_v52, %s2926_s10 }
 0xb70   :  { %v2908_v40 = vpop.eup %2907 }
 0xb71   :  { %1655 = vrot.lane.b32.xlu2 %v2908_v40, %s2925_s9 }
 0xbcb   :  { %v1656_v23 = vpop.permute.xlu2 %1655 }
 0xbcc   :  { %v1658_v19 = vmul.f32 %v1656_v23, %v1637_v20 }
 0xbce   :  { %1660 = vrot.lane.b32.xlu0 %v1658_v19, %s2927_s13  ;;  %v3735_v19 = vld [vmem:[%s4049_s1 + $0x28] sm:$0xff] }
 0xbcf   :  { %vm48_vm7 = vcmp.gt.f32.partialorder %v3735_v19, 0.5  ;;  %v2366_v19 = vld [vmem:[%s4051_s4 + $0x30] sm:$0xff] }
 0xbdc   :  { %v1666_v51 = vpop.permute.xlu1 %1665 }
 0xbdd   :  { %v3680_v46 = vsel %vm47_vm6, %v1666_v51, %v3619_v62 }
 0xbde   :  { %1869 = vrot.lane.b32.xlu0 %v3680_v46, %s2925_s9 }
 0xc40   :  { %v3684_v17 = vpop.permute.xlu0 %1660 }
 0xc41   :  { %v3690_v3 = vsel %vm47_vm6, %v3684_v17, %v3629_v7 }
 0xc42   :  { %v1677_v5 = vsel %vm521_vm2, %v3690_v3, 0 }
 0xc43   :  { %v1699_v18 = vand.u32 4294901760, %v1677_v5 }
 0xc45   :  { %v1700_v21 = vsub.f32 %v1677_v5, %v1699_v18  ;;  %1745 = vmatmul.f32.vlgmr.msrb.gmra.mxu3 %v1699_v18 }
 0xc46   :  { %2022 = vmatpush.msrb.mxu3 %v3116_v12 }
 0xc47   :  { %1775 = vmatmul.f32.vlgmr.msra.gmra.mxu0 %v1700_v21  ;;  %v1701_v62 = vand.u32 4294901760, %v1700_v21 }
 0xc48   :  { %2024 = vmatpush.msrb.mxu3 %v3161_v42  ;;  %2051 = vmatpush.msra.mxu0 %v3154_v38 }
 0xc49   :  { %1802 = vmatmul.f32.vlgmr.msra.gmra.mxu1 %v1701_v62  ;;  %v1702_v6 = vsub.f32 %v1700_v21, %v1701_v62 }
 0xc4a   :  { %2026 = vmatpush.msrb.mxu3 %v3197_v50  ;;  %2082 = vmatpush.msra.mxu1 %v3116_v12 }
 0xc4b   :  { %v1703_v7 = vand.u32 4294901760, %v1702_v6  ;;  %2055 = vmatpush.msra.mxu0 %v3226_v9 }
 0xc4c   :  { %2028 = vmatpush.msrb.mxu3 %v3206_v53  ;;  %2084 = vmatpush.msra.mxu1 %v3161_v42 }
 0xc4d   :  { %1704 = vmatmul.f32.vlgmr.msrb.gmra.mxu2 %v1703_v7  ;;  %1860 = vmatmul.f32.vlgmr.msra.gmra.mxu3 %v1699_v18 }
 0xc4e   :  { %1993 = vmatpush.msrb.mxu2 %v3145_v35  ;;  %2086 = vmatpush.msra.mxu1 %v3197_v50 }
 0xc4f   :  { %2059 = vmatpush.msra.mxu0 %v3251_v31  ;;  %2185 = vmatpush.msra.mxu3 %v3183_v28  ;;  %v154_v28 = vadd.f32 %v3399_v43, %v3348_v33 }
 0xc50   :  { %1996 = vmatpush.msrb.mxu2 %v3220_v8  ;;  %2088 = vmatpush.msra.mxu1 %v3206_v53 }
 0xc51   :  { %2063 = vmatpush.msra.mxu0 %v3279_v55  ;;  %2191 = vmatpush.msra.mxu3 %v3233_v14  ;;  %v241_v14 = vadd.f32 %v3350_v36, %v154_v28 }
 0xc52   :  { %1999 = vmatpush.msrb.mxu2 %v3247_v29 }
 0xc53   :  { %2197 = vmatpush.msra.mxu3 %v3259_v54  ;;  %v308_v63 = vadd.f32 %v3376_v16, %v241_v14  ;;  %v4069_v14 = vld [vmem:[#allocation6_spill] sm:$0xff] }
 0xc54   :  { %2002 = vmatpush.msrb.mxu2 %v3275_v48 }
 0xc55   :  { %1835 = vmatmul.f32.vlgmr.msra.gmra.mxu2 %v1699_v18  ;;  %2203 = vmatpush.msra.mxu3 %v3286_v58  ;;  %v377_v58 = vadd.f32 %v3378_v30, %v308_v63 }
 0xc56   :  { %2152 = vmatpush.msra.mxu2 %v3116_v12 }
 0xc57   :  { %v448_v25 = vadd.f32 %v3525_v60, %v377_v58  ;;  %v1870_v60 = vpop.permute.xlu0 %1869  ;;  %v4071_v58 = vld [vmem:[#allocation13_spill] sm:$0xff] }
 0xc58   :  { %2154 = vmatpush.msra.mxu2 %v3161_v42 }
 0xc59   :  { %v503_v33 = vadd.f32 %v3527_v59, %v448_v25 }
 0xc5a   :  { %2156 = vmatpush.msra.mxu2 %v3197_v50 }
 0xc5c   :  { %2158 = vmatpush.msra.mxu2 %v3206_v53 }
 0xcc4   :  { %v1776_v41 = vpop.f32.mrf.mxu0 }
 0xcc6   :  { %v1803_v44 = vpop.f32.mrf.mxu1 }
 0xcc8   :  { %v1746_v37 = vpop.f32.mrf.mxu3 }
 0xcd0   :  { %v1705_v54 = vpop.f32.mrf.mxu2  ;;  %v1861_v11 = vpop.f32.mrf.mxu3 }
 0xcd1   :  { %v1747_v24 = vadd.f32 %v1746_v37, %v1705_v54  ;;  %v4070_v54 = vld [vmem:[#allocation12_spill] sm:$0xff] }
 0xcd3   :  { %v1777_v39 = vadd.f32 %v1776_v41, %v1747_v24 }
 0xcd5   :  { %v1804_v2 = vadd.f32 %v1803_v44, %v1777_v39 }
 0xcd8   :  { %v1836_v27 = vpop.f32.mrf.mxu2 }
 0xcd9   :  { %v1837_v47 = vadd.f32 %v1836_v27, %v1804_v2 }
 0xcdb   :  { %v1862_v20 = vadd.f32 %v1861_v11, %v1837_v47 }
 0xcdd   :  { %v1864_v36 = vadd.f32 %v1862_v20, %v503_v33 }
 0xcdf   :  { %2909 = vtanh.f32 %v1864_v36 }
 0xce5   :  { %v2910_v13 = vpop.eup %2909 }
 0xce6   :  { %v1866_v16 = vmul.f32 %v2910_v13, %v3409_v26 }
 0xce8   :  { %v1867_v22 = vadd.f32 %v3414_v61, %v1866_v16 }
 0xcea   :  { %1874 = vrot.lane.b32.xlu2 %v1867_v22, %s2925_s9  ;;  %v1872_v15 = vmul.f32 %v1870_v60, %v1867_v22 }
 0xd44   :  { %v1875_v30 = vpop.permute.xlu2 %1874 }
 0xd45   :  { %v1877_v0 = vmul.f32 %v1875_v30, %v1867_v22 }
 0xd47   :  { %1879 = vrot.lane.b32.xlu1 %v1877_v0, %s2925_s9 }
 0xdb9   :  { %v1880_v10 = vpop.permute.xlu1 %1879 }
 0xdba   :  { %v1882_v52 = vadd.f32 %v1880_v10, %v1872_v15 }
 0xdbc   :  { %2911 = vtanh.f32 %v1882_v52  ;;  %1895 = vrot.lane.b32.xlu1 %v1882_v52, %s2926_s10 }
 0xdc2   :  { %v2912_v59 = vpop.eup %2911 }
 0xdc3   :  { %1885 = vrot.lane.b32.xlu2 %v2912_v59, %s2925_s9 }
 0xe1d   :  { %v1886_v40 = vpop.permute.xlu2 %1885 }
 0xe1e   :  { %v1888_v23 = vmul.f32 %v1886_v40, %v1867_v22 }
 0xe20   :  { %1890 = vrot.lane.b32.xlu0 %v1888_v23, %s2927_s13  ;;  %v2921_v23 = vld [vmem:[%s4047_s3 + $0x50] ss:$0 sm:$0xff] }
 0xe2e   :  { %v1896_v51 = vpop.permute.xlu1 %1895 }
 0xe2f   :  { %v3741_v5 = vsel %vm48_vm7, %v1896_v51, %v3680_v46  ;;  %v4072_v51 = vld [vmem:[#allocation3_spill] sm:$0xff] }
 0xe30   :  { %2099 = vrot.lane.b32.xlu0 %v3741_v5, %s2925_s9 }
 0xe92   :  { %v3745_v18 = vpop.permute.xlu0 %1890 }
 0xe93   :  { %v3751_v21 = vsel %vm48_vm7, %v3745_v18, %v3690_v3 }
 0xe94   :  { %v1907_v62 = vsel %vm521_vm2, %v3751_v21, 0 }
 0xe95   :  { %v1929_v6 = vand.u32 4294901760, %v1907_v62 }
 0xe97   :  { %v1930_v7 = vsub.f32 %v1907_v62, %v1929_v6  ;;  %1975 = vmatmul.f32.vlgmr.msrb.gmra.mxu1 %v1929_v6 }
 0xe98   :  { %2252 = vmatpush.msrb.mxu1 %v3116_v12 }
 0xe99   :  { %v1931_v46 = vand.u32 4294901760, %v1930_v7  ;;  %2005 = vmatmul.f32.vlgmr.msrb.gmra.mxu2 %v1930_v7 }
 0xe9a   :  { %2254 = vmatpush.msrb.mxu1 %v3161_v42  ;;  %2281 = vmatpush.msrb.mxu2 %v3154_v38 }
 0xe9b   :  { %2032 = vmatmul.f32.vlgmr.msrb.gmra.mxu3 %v1931_v46  ;;  %v1932_v28 = vsub.f32 %v1930_v7, %v1931_v46  ;;  %v4074_v46 = vld [vmem:[#allocation7_spill] sm:$0xff] }
 0xe9c   :  { %2256 = vmatpush.msrb.mxu1 %v3197_v50  ;;  %2312 = vmatpush.msrb.mxu3 %v3116_v12  ;;  %v162_v12 = vadd.f32 %v3399_v43, %v3352_v45 }
 0xe9d   :  { %v1933_v3 = vand.u32 4294901760, %v1932_v28  ;;  %2285 = vmatpush.msrb.mxu2 %v3226_v9 }
 0xe9e   :  { %2258 = vmatpush.msrb.mxu1 %v3206_v53  ;;  %2314 = vmatpush.msrb.mxu3 %v3161_v42 }
 0xe9f   :  { %1934 = vmatmul.f32.vlgmr.msrb.gmra.mxu0 %v1933_v3  ;;  %2090 = vmatmul.f32.vlgmr.msra.gmra.mxu1 %v1929_v6 }
 0xea0   :  { %2223 = vmatpush.msrb.mxu0 %v3145_v35  ;;  %2316 = vmatpush.msrb.mxu3 %v3197_v50  ;;  %v245_v35 = vadd.f32 %v3354_v56, %v162_v12  ;;  %v4068_v50 = vld [vmem:[#allocation5_spill] sm:$0xff] }
 0xea1   :  { %2289 = vmatpush.msrb.mxu2 %v3251_v31 }
 0xea2   :  { %2226 = vmatpush.msrb.mxu0 %v3220_v8  ;;  %2318 = vmatpush.msrb.mxu3 %v3206_v53  ;;  %v313_v9 = vadd.f32 %v4068_v50, %v245_v35  ;;  %v2100_v47 = vpop.permute.xlu0 %2099  ;;  %v4075_v35 = vld [vmem:[#allocation8_spill] sm:$0xff] }
 0xea3   :  { %2293 = vmatpush.msrb.mxu2 %v3279_v55 }
 0xea4   :  { %2229 = vmatpush.msrb.mxu0 %v3247_v29  ;;  %v383_v53 = vadd.f32 %v4069_v14, %v313_v9 }
 0xea6   :  { %2232 = vmatpush.msrb.mxu0 %v3275_v48  ;;  %v452_v29 = vadd.f32 %v4070_v54, %v383_v53 }
 0xea7   :  { %2065 = vmatmul.f32.vlgmr.msra.gmra.mxu0 %v1929_v6 }
 0xea8   :  { %v507_v45 = vadd.f32 %v4071_v58, %v452_v29 }
 0xf14   :  { %v1976_v38 = vpop.f32.mrf.mxu1 }
 0xf1c   :  { %v1935_v42 = vpop.f32.mrf.mxu0  ;;  %v2006_v8 = vpop.f32.mrf.mxu2 }
 0xf1d   :  { %v1977_v31 = vadd.f32 %v1976_v38, %v1935_v42  ;;  %v2091_v41 = vpop.f32.mrf.mxu1 }
 0xf1e   :  { %v2033_v55 = vpop.f32.mrf.mxu3 }
 0xf1f   :  { %v2007_v37 = vadd.f32 %v2006_v8, %v1977_v31 }
 0xf21   :  { %v2034_v63 = vadd.f32 %v2033_v55, %v2007_v37  ;;  %v4076_v37 = vld [vmem:[#allocation14_spill] sm:$0xff] }
 0xf24   :  { %v2066_v48 = vpop.f32.mrf.mxu0 }
 0xf25   :  { %v2067_v24 = vadd.f32 %v2066_v48, %v2034_v63  ;;  %v2922_v48 = vld [vmem:[%s4047_s3 + $0x58] ss:$0 sm:$0xff] }
 0xf27   :  { %v2092_v43 = vadd.f32 %v2091_v41, %v2067_v24  ;;  %v2923_v41 = vld [vmem:[%s4047_s3 + $0x60] ss:$0 sm:$0xff] }
 0xf29   :  { %v2094_v56 = vadd.f32 %v2092_v43, %v507_v45  ;;  %v4077_v43 = vld [vmem:[#allocation9_spill] sm:$0xff] }
 0xf2b   :  { %2913 = vtanh.f32 %v2094_v56 }
 0xf31   :  { %v2914_v39 = vpop.eup %2913 }
 0xf32   :  { %v2096_v44 = vmul.f32 %v2914_v39, %v3409_v26  ;;  %v1439_v39 = vsel %vm46_vm5, %v3623_v49, 0.0 }
 0xf34   :  { %v2097_v25 = vadd.f32 %v3414_v61, %v2096_v44  ;;  %v41_v61 = vld [vmem:[%s4049_s1 + $0x30] sm:$0xff]  ;;  %v513_v44 = vld [vmem:[%s4050_s2] sm:$0xff] }
 0xf35   :  { %vm49_vm8 = vcmp.gt.f32.partialorder %v41_v61, 0.5  ;;  %522 = vst.msk [vmem:[#allocation2] sm:$0xff] %vm521_vm2, %v513_v44 }
 0xf36   :  { %2104 = vrot.lane.b32.xlu2 %v2097_v25, %s2925_s9  ;;  %v2102_v11 = vmul.f32 %v2100_v47, %v2097_v25 }
 0xf90   :  { %v2105_v2 = vpop.permute.xlu2 %2104 }
 0xf91   :  { %v2107_v27 = vmul.f32 %v2105_v2, %v2097_v25  ;;  %v516_v2 = vld [vmem:[%s4050_s2 + $0x18] sm:$0xff] }
 0xf92   :  { %525 = vst.msk [vmem:[#allocation2 + $0x18] sm:$0xff] %vm521_vm2, %v516_v2 }
 0xf93   :  { %2109 = vrot.lane.b32.xlu1 %v2107_v27, %s2925_s9 }
0x1005   :  { %v2110_v33 = vpop.permute.xlu1 %2109 }
0x1006   :  { %v2112_v20 = vadd.f32 %v2110_v33, %v2102_v11 }
0x1008   :  { %2915 = vtanh.f32 %v2112_v20  ;;  %2125 = vrot.lane.b32.xlu1 %v2112_v20, %s2926_s10 }
0x100e   :  { %v2916_v36 = vpop.eup %2915 }
0x100f   :  { %2115 = vrot.lane.b32.xlu2 %v2916_v36, %s2925_s9 }
0x1069   :  { %v2116_v13 = vpop.permute.xlu2 %2115 }
0x106a   :  { %v2118_v26 = vmul.f32 %v2116_v13, %v2097_v25  ;;  %v520_v25 = vld [vmem:[%s4050_s2 + $0x38] sm:$0xff] }
0x106b   :  { %529 = vst.msk [vmem:[#allocation2 + $0x38] sm:$0xff] %vm521_vm2, %v520_v25 }
0x106c   :  { %2120 = vrot.lane.b32.xlu0 %v2118_v26, %s2927_s13 }
0x107a   :  { %v2126_v16 = vpop.permute.xlu1 %2125 }
0x107b   :  { %v2128_v22 = vsel %vm49_vm8, %v2126_v16, %v3741_v5  ;;  %v170_v5 = vadd.f32 %v2921_v23, %v4072_v51  ;;  %v4078_v16 = vld [vmem:[#allocation11_spill] sm:$0xff] }
0x107c   :  { %2329 = vrot.lane.b32.xlu0 %v2128_v22, %s2925_s9 }
0x10de   :  { %v2121_v30 = vpop.permute.xlu0 %2120 }
0x10df   :  { %v2123_v0 = vsel %vm49_vm8, %v2121_v30, %v3751_v21  ;;  %v4073_v21 = vld [vmem:[#allocation4_spill] sm:$0xff]  ;;  %v2129_v56 = vsel %vm49_vm8, %v2121_v30, 0.0  ;;  %v979_v30 = vsel %vm44_vm3, %v4078_v16, 0.0 }
0x10e0   :  { %v2137_v60 = vsel %vm521_vm2, %v2123_v0, 0  ;;  %v249_v62 = vadd.f32 %v4073_v21, %v170_v5  ;;  %v1899_v0 = vsel %vm48_vm7, %v3745_v18, 0.0 }
0x10e1   :  { %v2159_v15 = vand.u32 4294901760, %v2137_v60 }
0x10e2   :  { %v318_v28 = vadd.f32 %v4074_v46, %v249_v62  ;;  %v42_v62 = vld [vmem:[%s4049_s1 + $0x38] sm:$0xff] }
0x10e3   :  { %v2160_v10 = vsub.f32 %v2137_v60, %v2159_v15  ;;  %2205 = vmatmul.f32.vlgmr.msra.gmra.mxu3 %v2159_v15  ;;  %v514_v60 = vld [vmem:[%s4050_s2 + $0x8] sm:$0xff]  ;;  %vm50_vm11 = vcmp.gt.f32.partialorder %v42_v62, 0.5 }
0x10e4   :  { %v389_v38 = vadd.f32 %v4075_v35, %v318_v28  ;;  %523 = vst.msk [vmem:[#allocation2 + $0x8] sm:$0xff] %vm521_vm2, %v514_v60  ;;  %v1669_v35 = vsel %vm47_vm6, %v3684_v17, 0.0 }
0x10e5   :  { %2235 = vmatmul.f32.vlgmr.msrb.gmra.mxu0 %v2160_v10  ;;  %v2161_v52 = vand.u32 4294901760, %v2160_v10 }
0x10e6   :  { %v456_v9 = vadd.f32 %v3537_v57, %v389_v38  ;;  %v2365_v38 = vld [vmem:[%s4051_s4 + $0x28] sm:$0xff] }
0x10e7   :  { %v2162_v59 = vsub.f32 %v2160_v10, %v2161_v52  ;;  %2262 = vmatmul.f32.vlgmr.msrb.gmra.mxu1 %v2161_v52  ;;  %v2367_v10 = vld [vmem:[%s4051_s4 + $0x38] sm:$0xff]  ;;  %v3865_v52 = vand.u32 4294901760, %v2366_v19  ;;  %v3906_v34 = vand.u32 4294901760, %v2365_v38 }
0x10e8   :  { %v511_v55 = vadd.f32 %v4076_v37, %v456_v9  ;;  %v3863_v18 = vand.u32 4294901760, %v2367_v10 }
0x10e9   :  { %v2163_v40 = vand.u32 4294901760, %v2162_v59 }
0x10ea   :  { %v3868_v59 = vsub.f32 %v2367_v10, %v3863_v18  ;;  %2663 = vmatpush.msra.mxu3 %v3863_v18  ;;  %2412 = vmatpush.msra.mxu0 %v3863_v18 }
0x10eb   :  { %2164 = vmatmul.f32.vlgmr.msra.gmra.mxu2 %v2163_v40  ;;  %2320 = vmatmul.f32.vlgmr.msrb.gmra.mxu3 %v2159_v15  ;;  %v3871_v40 = vsub.f32 %v2366_v19, %v3865_v52 }
0x10ec   :  { %v2502_v23 = vand.u32 4294901760, %v3868_v59  ;;  %2591 = vmatpush.msra.mxu2 %v3868_v59  ;;  %2665 = vmatpush.msra.mxu3 %v3865_v52 }
0x10ed   :  { %v2508_v51 = vand.u32 4294901760, %v3871_v40  ;;  %2414 = vmatpush.msra.mxu0 %v3865_v52 }
0x10ee   :  { %v2330_v49 = vpop.permute.xlu0 %2329  ;;  %v2503_v5 = vsub.f32 %v3868_v59, %v2502_v23  ;;  %2594 = vmatpush.msra.mxu2 %v3871_v40  ;;  %2667 = vmatpush.msra.mxu3 %v3906_v34 }
0x10ef   :  { %v2509_v21 = vsub.f32 %v3871_v40, %v2508_v51  ;;  %2416 = vmatpush.msra.mxu0 %v3906_v34 }
0x10f3   :  { %2295 = vmatmul.f32.vlgmr.msrb.gmra.mxu2 %v2159_v15  ;;  %v519_v15 = vld [vmem:[%s4050_s2 + $0x30] sm:$0xff] }
0x10f4   :  { %528 = vst.msk [vmem:[#allocation2 + $0x30] sm:$0xff] %vm521_vm2, %v519_v15 }
0x1162   :  { %v2236_v12 = vpop.f32.mrf.mxu0 }
0x1164   :  { %v2263_v50 = vpop.f32.mrf.mxu1 }
0x1166   :  { %v2206_v6 = vpop.f32.mrf.mxu3 }
0x116e   :  { %v2165_v7 = vpop.f32.mrf.mxu2  ;;  %v2321_v53 = vpop.f32.mrf.mxu3 }
0x116f   :  { %v2207_v3 = vadd.f32 %v2206_v6, %v2165_v7  ;;  %v2504_v6 = vand.u32 4294901760, %v2503_v5  ;;  %v2510_v7 = vand.u32 4294901760, %v2509_v21 }
0x1171   :  { %v2237_v42 = vadd.f32 %v2236_v12, %v2207_v3  ;;  %2505 = vmatpush.msra.mxu1 %v2504_v6  ;;  %v1209_v12 = vsel %vm45_vm4, %v3562_v32, 0.0  ;;  %v2364_v32 = vld [vmem:[%s4051_s4 + $0x20] sm:$0xff] }
0x1173   :  { %v2264_v31 = vadd.f32 %v2263_v50, %v2237_v42  ;;  %2511 = vmatpush.msra.mxu1 %v2510_v7  ;;  %v2513_v42 = vsub.f32 %v2365_v38, %v3906_v34  ;;  %v3912_v50 = vand.u32 4294901760, %v2364_v32 }
0x1175   :  { %v2514_v17 = vand.u32 4294901760, %v2513_v42  ;;  %v2519_v9 = vsub.f32 %v2364_v32, %v3912_v50  ;;  %2597 = vmatpush.msra.mxu2 %v2513_v42  ;;  %2669 = vmatpush.msra.mxu3 %v3912_v50 }
0x1176   :  { %v2296_v8 = vpop.f32.mrf.mxu2  ;;  %2418 = vmatpush.msra.mxu0 %v3912_v50 }
0x1177   :  { %v2297_v14 = vadd.f32 %v2296_v8, %v2264_v31  ;;  %v3920_v31 = vand.u32 4294901760, %v2363_v1  ;;  %v2362_v8 = vld [vmem:[%s4051_s4 + $0x10] sm:$0xff]  ;;  %2600 = vmatpush.msra.mxu2 %v2519_v9 }
0x1179   :  { %v2322_v54 = vadd.f32 %v2321_v53, %v2297_v14  ;;  %v2515_v14 = vsub.f32 %v2513_v42, %v2514_v17  ;;  %v2520_v53 = vand.u32 4294901760, %v2519_v9  ;;  %v2525_v37 = vsub.f32 %v2363_v1, %v3920_v31  ;;  %2671 = vmatpush.msra.mxu3 %v3920_v31  ;;  %2420 = vmatpush.msra.mxu0 %v3920_v31 }
0x117b   :  { %v2324_v29 = vadd.f32 %v2322_v54, %v511_v55  ;;  %v2421_v55 = vand.u32 4294901760, %v2362_v8  ;;  %v2361_v54 = vld [vmem:[%s4051_s4 + $0x8] sm:$0xff]  ;;  %2603 = vmatpush.msra.mxu2 %v2525_v37 }
0x117d   :  { %2917 = vtanh.f32 %v2324_v29  ;;  %v2516_v29 = vand.u32 4294901760, %v2515_v14  ;;  %2673 = vmatpush.msra.mxu3 %v2421_v55  ;;  %2422 = vmatpush.msra.mxu0 %v2421_v55 }
0x117f   :  { %2517 = vmatpush.msra.mxu1 %v2516_v29 }
0x1183   :  { %v2918_v63 = vpop.eup %2917 }
0x1184   :  { %v2326_v24 = vmul.f32 %v2922_v48, %v2918_v63  ;;  %v2521_v63 = vsub.f32 %v2519_v9, %v2520_v53  ;;  %v2526_v48 = vand.u32 4294901760, %v2525_v37 }
0x1186   :  { %v2327_v57 = vadd.f32 %v2923_v41, %v2326_v24  ;;  %v2531_v24 = vsub.f32 %v2362_v8, %v2421_v55  ;;  %v515_v41 = vld [vmem:[%s4050_s2 + $0x10] sm:$0xff] }
0x1187   :  { %524 = vst.msk [vmem:[#allocation2 + $0x10] sm:$0xff] %vm521_vm2, %v515_v41 }
0x1188   :  { %2334 = vrot.lane.b32.xlu2 %v2327_v57, %s2925_s9  ;;  %v2332_v27 = vmul.f32 %v2330_v49, %v2327_v57  ;;  %2606 = vmatpush.msra.mxu2 %v2531_v24 }
0x11e2   :  { %v2335_v58 = vpop.permute.xlu2 %2334 }
0x11e3   :  { %v2337_v45 = vmul.f32 %v2335_v58, %v2327_v57  ;;  %v2423_v58 = vand.u32 4294901760, %v2361_v54 }
0x11e5   :  { %2339 = vrot.lane.b32.xlu1 %v2337_v45, %s2925_s9  ;;  %v2360_v45 = vld [vmem:[%s4051_s4] sm:$0xff]  ;;  %v2537_v25 = vsub.f32 %v2361_v54, %v2423_v58  ;;  %2675 = vmatpush.msra.mxu3 %v2423_v58 }
0x11e6   :  { %v2425_v44 = vand.u32 4294901760, %v2360_v45  ;;  %2424 = vmatpush.msra.mxu0 %v2423_v58 }
0x11e7   :  { %2609 = vmatpush.msra.mxu2 %v2537_v25 }
0x11e8   :  { %v2543_v49 = vsub.f32 %v2360_v45, %v2425_v44  ;;  %2677 = vmatpush.msra.mxu3 %v2425_v44  ;;  %2426 = vmatpush.msra.mxu0 %v2425_v44 }
0x11ea   :  { %2612 = vmatpush.msra.mxu2 %v2543_v49  ;;  %2738 = vmatpush.msrb.mxu0 %v2502_v23 }
0x11ec   :  { %2742 = vmatpush.msrb.mxu0 %v2508_v51 }
0x11ed   :  { %750 = vrot.lane.b32.xlu1 %v4077_v43, %s2925_s9  ;;  %v2522_v43 = vand.u32 4294901760, %v2521_v63 }
0x11ee   :  { %2746 = vmatpush.msrb.mxu0 %v2514_v17 }
0x11ef   :  { %2523 = vmatpush.msra.mxu1 %v2522_v43 }
0x11f0   :  { %2750 = vmatpush.msrb.mxu0 %v2520_v53 }
0x11f2   :  { %2754 = vmatpush.msrb.mxu0 %v2526_v48 }
0x11f5   :  { %2131 = vrot.lane.b32.xlu1 %v2129_v56, %s2925_s9  ;;  %v2527_v56 = vsub.f32 %v2525_v37, %v2526_v48 }
0x11f7   :  { %v2528_v2 = vand.u32 4294901760, %v2527_v56 }
0x11f9   :  { %2529 = vmatpush.msra.mxu1 %v2528_v2 }
0x11fd   :  { %1441 = vrot.lane.b32.xlu1 %v1439_v39, %s2925_s9  ;;  %v2532_v39 = vand.u32 4294901760, %v2531_v24 }
0x11ff   :  { %v2533_v4 = vsub.f32 %v2531_v24, %v2532_v39  ;;  %2758 = vmatpush.msrb.mxu0 %v2532_v39 }
0x1257   :  { %v2340_v47 = vpop.permute.xlu1 %2339 }
0x1258   :  { %v2342_v11 = vadd.f32 %v2340_v47, %v2332_v27  ;;  %v2538_v27 = vand.u32 4294901760, %v2537_v25  ;;  %v2534_v47 = vand.u32 4294901760, %v2533_v4 }
0x125a   :  { %2919 = vtanh.f32 %v2342_v11  ;;  %v2544_v11 = vand.u32 4294901760, %v2543_v49  ;;  %2535 = vmatpush.msra.mxu1 %v2534_v47  ;;  %2762 = vmatpush.msrb.mxu0 %v2538_v27 }
0x125c   :  { %2766 = vmatpush.msrb.mxu0 %v2544_v11 }
0x125f   :  { %v751_v33 = vpop.permute.xlu1 %750 }
0x1260   :  { %v2920_v20 = vpop.eup %2919  ;;  %754 = vst.msk [vmem:[#allocation2] sm:$0xff] %vm753_vm9, %v751_v33 }
0x1261   :  { %756 = vst.msk [vmem:[#allocation2 + $0x38] sm:$0xff] %vm755_vm10, %v751_v33  ;;  %2345 = vrot.lane.b32.xlu2 %v2920_v20, %s2925_s9  ;;  %v2539_v33 = vsub.f32 %v2537_v25, %v2538_v27  ;;  %v2545_v20 = vsub.f32 %v2543_v49, %v2544_v11 }
0x1267   :  { %v2132_v36 = vpop.permute.xlu1 %2131 }
0x126f   :  { %v1442_v13 = vpop.permute.xlu1 %1441 }
0x1270   :  { %1444 = vst.msk [vmem:[#allocation2 + $0x18] sm:$0xff] %vm753_vm9, %v1442_v13 }
0x1271   :  { %1445 = vst.msk [vmem:[#allocation2 + $0x20] sm:$0xff] %vm755_vm10, %v1442_v13  ;;  %v2546_v13 = vand.u32 4294901760, %v2545_v20 }
0x12bb   :  { %v2346_v26 = vpop.permute.xlu2 %2345 }
0x12bc   :  { %v2348_v61 = vmul.f32 %v2346_v26, %v2327_v57  ;;  %v518_v57 = vld [vmem:[%s4050_s2 + $0x28] sm:$0xff] }
0x12bd   :  { %527 = vst.msk [vmem:[#allocation2 + $0x28] sm:$0xff] %vm521_vm2, %v518_v57 }
0x12be   :  { %2350 = vrot.lane.b32.xlu0 %v2348_v61, %s2927_s13 }
0x12c6   :  { %981 = vrot.lane.b32.xlu0 %v979_v30, %s2925_s9 }
0x12ce   :  { %1901 = vrot.lane.b32.xlu0 %v1899_v0, %s2925_s9 }
0x1330   :  { %v2351_v46 = vpop.permute.xlu0 %2350 }
0x1331   :  { %v2353_v28 = vsel %vm50_vm11, %v2351_v46, 0.0 }
0x1332   :  { %2355 = vrot.lane.b32.xlu2 %v2353_v28, %s2925_s9 }
0x1338   :  { %v982_v3 = vpop.permute.xlu0 %981 }
0x1339   :  { %984 = vst.msk [vmem:[#allocation2 + $0x8] sm:$0xff] %vm753_vm9, %v982_v3 }
0x133a   :  { %985 = vst.msk [vmem:[#allocation2 + $0x30] sm:$0xff] %vm755_vm10, %v982_v3  ;;  %1211 = vrot.lane.b32.xlu2 %v1209_v12, %s2925_s9 }
0x133b   :  { %2134 = vst.msk [vmem:[#allocation2 + $0x30] sm:$0xff] %vm753_vm9, %v2132_v36 }
0x133c   :  { %2135 = vst.msk [vmem:[#allocation2 + $0x8] sm:$0xff] %vm755_vm10, %v2132_v36  ;;  %v2540_v36 = vand.u32 4294901760, %v2539_v33 }
0x133e   :  { %2541 = vmatpush.msra.mxu1 %v2540_v36 }
0x1340   :  { %2547 = vmatpush.msra.mxu1 %v2546_v13  ;;  %v1902_v0 = vpop.permute.xlu0 %1901 }
0x1342   :  { %1671 = vrot.lane.b32.xlu2 %v1669_v35, %s2925_s9  ;;  %2809 = vmatpush.msrb.mxu1 %v3863_v18  ;;  %v2375_v54 = vld [vmem:[#allocation2 + $0x30] sm:$0xff] }
0x1343   :  { %v2370_v61 = vld [vmem:[#allocation2 + $0x8] sm:$0xff]  ;;  %v2398_v48 = vsel %vm2378_vm12, %v2375_v54, 0 }
0x1344   :  { %2811 = vmatpush.msrb.mxu1 %v3865_v52  ;;  %v2383_v22 = vsel %vm2378_vm12, %v2370_v61, 0  ;;  %v2475_v57 = vand.u32 4294901760, %v2398_v48 }
0x1345   :  { %v3962_v10 = vand.u32 4294901760, %v2383_v22 }
0x1346   :  { %2813 = vmatpush.msrb.mxu1 %v3906_v34  ;;  %v2476_v43 = vsub.f32 %v2398_v48, %v2475_v57 }
0x1347   :  { %v2436_v52 = vsub.f32 %v2383_v22, %v3962_v10 }
0x1348   :  { %2815 = vmatpush.msrb.mxu1 %v3912_v50 }
0x1349   :  { %v2437_v51 = vand.u32 4294901760, %v2436_v52 }
0x134a   :  { %2817 = vmatpush.msrb.mxu1 %v3920_v31 }
0x134b   :  { %v2438_v6 = vsub.f32 %v2436_v52, %v2437_v51 }
0x134c   :  { %2819 = vmatpush.msrb.mxu1 %v2421_v55 }
0x134d   :  { %v2439_v3 = vand.u32 4294901760, %v2438_v6 }
0x134e   :  { %2821 = vmatpush.msrb.mxu1 %v2423_v58 }
0x1350   :  { %2823 = vmatpush.msrb.mxu1 %v2425_v44  ;;  %v2477_v44 = vand.u32 4294901760, %v2476_v43 }
0x1352   :  { %v2478_v2 = vsub.f32 %v2476_v43, %v2477_v44 }
0x1354   :  { %v2479_v49 = vand.u32 4294901760, %v2478_v2 }
0x138c   :  { %v2356_v26 = vpop.permute.xlu2 %2355 }
0x138d   :  { %2358 = vst.msk [vmem:[#allocation2 + $0x38] sm:$0xff] %vm753_vm9, %v2356_v26 }
0x138e   :  { %2359 = vst.msk [vmem:[#allocation2] sm:$0xff] %vm755_vm10, %v2356_v26 }
0x1394   :  { %v1212_v16 = vpop.permute.xlu2 %1211  ;;  %v2376_v58 = vld [vmem:[#allocation2 + $0x38] sm:$0xff] }
0x1395   :  { %1214 = vst.msk [vmem:[#allocation2 + $0x10] sm:$0xff] %vm753_vm9, %v1212_v16  ;;  %v2369_v30 = vld [vmem:[#allocation2] sm:$0xff]  ;;  %v2401_v56 = vsel %vm2378_vm12, %v2376_v58, 0 }
0x1396   :  { %1215 = vst.msk [vmem:[#allocation2 + $0x28] sm:$0xff] %vm755_vm10, %v1212_v16  ;;  %v2380_v60 = vsel %vm2378_vm12, %v2369_v30, 0  ;;  %v2483_v25 = vand.u32 4294901760, %v2401_v56 }
0x1397   :  { %1904 = vst.msk [vmem:[#allocation2 + $0x28] sm:$0xff] %vm753_vm9, %v1902_v0  ;;  %v3960_v15 = vand.u32 4294901760, %v2380_v60 }
0x1398   :  { %1905 = vst.msk [vmem:[#allocation2 + $0x10] sm:$0xff] %vm755_vm10, %v1902_v0  ;;  %v2484_v4 = vsub.f32 %v2401_v56, %v2483_v25 }
0x1399   :  { %v2428_v19 = vsub.f32 %v2380_v60, %v3960_v15  ;;  %2549 = vmatmul.f32.vlgmr.msra.gmra.mxu1 %v3960_v15 }
0x139a   :  { %v2485_v27 = vand.u32 4294901760, %v2484_v4 }
0x139b   :  { %2615 = vmatmul.f32.vlgmr.msra.gmra.mxu2 %v2428_v19  ;;  %v2429_v18 = vand.u32 4294901760, %v2428_v19 }
0x139c   :  { %v1672_v59 = vpop.permute.xlu2 %1671  ;;  %v2486_v47 = vsub.f32 %v2484_v4, %v2485_v27 }
0x139d   :  { %2681 = vmatmul.f32.vlgmr.msra.gmra.mxu3 %v2429_v18  ;;  %1674 = vst.msk [vmem:[#allocation2 + $0x20] sm:$0xff] %vm753_vm9, %v1672_v59  ;;  %v2430_v40 = vsub.f32 %v2428_v19, %v2429_v18  ;;  %v3998_v18 = vld [vmem:[%s4051_s4 + $0x40] ss:$0 sm:$0xff] }
0x139e   :  { %1675 = vst.msk [vmem:[#allocation2 + $0x18] sm:$0xff] %vm755_vm10, %v1672_v59  ;;  %v2374_v9 = vld [vmem:[#allocation2 + $0x28] sm:$0xff]  ;;  %v2487_v11 = vand.u32 4294901760, %v2486_v47 }
0x139f   :  { %v2431_v23 = vand.u32 4294901760, %v2430_v40  ;;  %v2371_v5 = vld [vmem:[#allocation2 + $0x10] sm:$0xff]  ;;  %v2395_v14 = vsel %vm2378_vm12, %v2374_v9, 0 }
0x13a0   :  { %v2386_v21 = vsel %vm2378_vm12, %v2371_v5, 0  ;;  %v2467_v55 = vand.u32 4294901760, %v2395_v14 }
0x13a1   :  { %2432 = vmatmul.f32.vlgmr.msra.gmra.mxu0 %v2431_v23  ;;  %2553 = vmatmul.f32.gmra.mxu1 %v3962_v10  ;;  %v3972_v62 = vand.u32 4294901760, %v2386_v21 }
0x13a2   :  { %v2468_v63 = vsub.f32 %v2395_v14, %v2467_v55 }
0x13a3   :  { %2620 = vmatmul.f32.gmra.mxu2 %v2436_v52  ;;  %v2444_v7 = vsub.f32 %v2386_v21, %v3972_v62 }
0x13a4   :  { %v2373_v38 = vld [vmem:[#allocation2 + $0x20] sm:$0xff]  ;;  %v2469_v41 = vand.u32 4294901760, %v2468_v63 }
0x13a5   :  { %2687 = vmatmul.f32.gmra.mxu3 %v2437_v51  ;;  %v2372_v46 = vld [vmem:[#allocation2 + $0x18] sm:$0xff]  ;;  %v2445_v12 = vand.u32 4294901760, %v2444_v7  ;;  %v2392_v42 = vsel %vm2378_vm12, %v2373_v38, 0 }
0x13a6   :  { %v2389_v28 = vsel %vm2378_vm12, %v2372_v46, 0  ;;  %v2459_v17 = vand.u32 4294901760, %v2392_v42  ;;  %v2470_v45 = vsub.f32 %v2468_v63, %v2469_v41 }
0x13a7   :  { %v3976_v35 = vand.u32 4294901760, %v2389_v28  ;;  %v2446_v34 = vsub.f32 %v2444_v7, %v2445_v12 }
0x13a8   :  { %v2460_v8 = vsub.f32 %v2392_v42, %v2459_v17  ;;  %v2471_v39 = vand.u32 4294901760, %v2470_v45 }
0x13a9   :  { %2440 = vmatmul.f32.gmra.mxu0 %v2439_v3  ;;  %2557 = vmatmul.f32.gmra.mxu1 %v3972_v62  ;;  %v2452_v32 = vsub.f32 %v2389_v28, %v3976_v35  ;;  %v2447_v50 = vand.u32 4294901760, %v2446_v34 }
0x13aa   :  { %v2461_v37 = vand.u32 4294901760, %v2460_v8 }
0x13ab   :  { %2625 = vmatmul.f32.gmra.mxu2 %v2444_v7  ;;  %v2453_v1 = vand.u32 4294901760, %v2452_v32 }
0x13ac   :  { %v2462_v29 = vsub.f32 %v2460_v8, %v2461_v37 }
0x13ad   :  { %2693 = vmatmul.f32.gmra.mxu3 %v2445_v12  ;;  %v2454_v31 = vsub.f32 %v2452_v32, %v2453_v1 }
0x13ae   :  { %v2463_v24 = vand.u32 4294901760, %v2462_v29 }
0x13af   :  { %v2455_v53 = vand.u32 4294901760, %v2454_v31 }
0x13b1   :  { %2448 = vmatmul.f32.gmra.mxu0 %v2447_v50  ;;  %2561 = vmatmul.f32.gmra.mxu1 %v3976_v35 }
0x13b3   :  { %2630 = vmatmul.f32.gmra.mxu2 %v2452_v32 }
0x13b5   :  { %2699 = vmatmul.f32.gmra.mxu3 %v2453_v1 }
0x13b9   :  { %2456 = vmatmul.f32.gmra.mxu0 %v2455_v53  ;;  %2565 = vmatmul.f32.gmra.mxu1 %v2459_v17 }
0x13bb   :  { %2635 = vmatmul.f32.gmra.mxu2 %v2460_v8 }
0x13bd   :  { %2705 = vmatmul.f32.gmra.mxu3 %v2461_v37 }
0x13c1   :  { %2464 = vmatmul.f32.gmra.mxu0 %v2463_v24  ;;  %2569 = vmatmul.f32.gmra.mxu1 %v2467_v55 }
0x13c3   :  { %2640 = vmatmul.f32.gmra.mxu2 %v2468_v63 }
0x13c5   :  { %2711 = vmatmul.f32.gmra.mxu3 %v2469_v41 }
0x13c9   :  { %2472 = vmatmul.f32.gmra.mxu0 %v2471_v39  ;;  %2573 = vmatmul.f32.gmra.mxu1 %v2475_v57 }
0x13cb   :  { %2645 = vmatmul.f32.gmra.mxu2 %v2476_v43 }
0x13cd   :  { %2717 = vmatmul.f32.gmra.mxu3 %v2477_v44 }
0x13d1   :  { %2480 = vmatmul.f32.gmra.mxu0 %v2479_v49  ;;  %2577 = vmatmul.f32.gmra.mxu1 %v2483_v25 }
0x13d3   :  { %2650 = vmatmul.f32.gmra.mxu2 %v2484_v4 }
0x13d5   :  { %2723 = vmatmul.f32.gmra.mxu3 %v2485_v27 }
0x13d9   :  { %2488 = vmatmul.f32.gmra.mxu0 %v2487_v11  ;;  %2825 = vmatmul.f32.vlgmr.msrb.gmra.mxu1 %v3960_v15 }
0x13e1   :  { %2768 = vmatmul.f32.vlgmr.msrb.gmra.mxu0 %v3960_v15  ;;  %2829 = vmatmul.f32.gmra.mxu1 %v3962_v10 }
0x13e9   :  { %2772 = vmatmul.f32.gmra.mxu0 %v3962_v10  ;;  %2833 = vmatmul.f32.gmra.mxu1 %v3972_v62 }
0x13f1   :  { %2776 = vmatmul.f32.gmra.mxu0 %v3972_v62  ;;  %2837 = vmatmul.f32.gmra.mxu1 %v3976_v35 }
0x13f9   :  { %2780 = vmatmul.f32.gmra.mxu0 %v3976_v35  ;;  %2841 = vmatmul.f32.gmra.mxu1 %v2459_v17 }
0x1401   :  { %2784 = vmatmul.f32.gmra.mxu0 %v2459_v17  ;;  %2845 = vmatmul.f32.gmra.mxu1 %v2467_v55 }
0x1409   :  { %2788 = vmatmul.f32.gmra.mxu0 %v2467_v55  ;;  %2849 = vmatmul.f32.gmra.mxu1 %v2475_v57 }
0x1411   :  { %2792 = vmatmul.f32.gmra.mxu0 %v2475_v57  ;;  %2853 = vmatmul.f32.gmra.mxu1 %v2483_v25 }
0x1416   :  { %v2550_v33 = vpop.f32.mrf.mxu1 }
0x1419   :  { %2796 = vmatmul.f32.gmra.mxu0 %v2483_v25 }
0x141e   :  { %v2433_v20 = vpop.f32.mrf.mxu0  ;;  %v2554_v36 = vpop.f32.mrf.mxu1 }
0x141f   :  { %v2616_v19 = vpop.f32.mrf.mxu2  ;;  %v2434_v23 = vadd.f32 %v3998_v18, %v2433_v20 }
0x1420   :  { %v2682_v52 = vpop.f32.mrf.mxu3 }
0x1421   :  { %v2551_v5 = vadd.f32 %v2550_v33, %v2434_v23 }
0x1423   :  { %v2617_v7 = vadd.f32 %v2616_v19, %v2551_v5 }
0x1425   :  { %v2683_v28 = vadd.f32 %v2682_v52, %v2617_v7 }
0x1426   :  { %v2441_v13 = vpop.f32.mrf.mxu0  ;;  %v2558_v26 = vpop.f32.mrf.mxu1 }
0x1427   :  { %v2621_v51 = vpop.f32.mrf.mxu2  ;;  %v2442_v46 = vadd.f32 %v3998_v18, %v2441_v13 }
0x1428   :  { %v2688_v6 = vpop.f32.mrf.mxu3 }
0x1429   :  { %v2555_v3 = vadd.f32 %v2554_v36, %v2442_v46 }
0x142b   :  { %v2622_v32 = vadd.f32 %v2621_v51, %v2555_v3 }
0x142d   :  { %v2689_v17 = vadd.f32 %v2688_v6, %v2622_v32 }
0x142e   :  { %v2449_v61 = vpop.f32.mrf.mxu0  ;;  %v2562_v16 = vpop.f32.mrf.mxu1 }
0x142f   :  { %v2626_v12 = vpop.f32.mrf.mxu2  ;;  %v2450_v42 = vadd.f32 %v3998_v18, %v2449_v61 }
0x1430   :  { %v2694_v1 = vpop.f32.mrf.mxu3 }
0x1431   :  { %v2559_v9 = vadd.f32 %v2558_v26, %v2450_v42 }
0x1433   :  { %v2627_v37 = vadd.f32 %v2626_v12, %v2559_v9 }
0x1435   :  { %v2695_v63 = vadd.f32 %v2694_v1, %v2627_v37 }
0x1436   :  { %v2457_v22 = vpop.f32.mrf.mxu0  ;;  %v2566_v30 = vpop.f32.mrf.mxu1 }
0x1437   :  { %v2631_v53 = vpop.f32.mrf.mxu2  ;;  %v2458_v55 = vadd.f32 %v3998_v18, %v2457_v22 }
0x1438   :  { %v2700_v29 = vpop.f32.mrf.mxu3 }
0x1439   :  { %v2563_v48 = vadd.f32 %v2562_v16, %v2458_v55 }
0x143b   :  { %v2632_v58 = vadd.f32 %v2631_v53, %v2563_v48 }
0x143d   :  { %v2701_v39 = vadd.f32 %v2700_v29, %v2632_v58 }
0x143e   :  { %v2465_v0 = vpop.f32.mrf.mxu0  ;;  %v2570_v60 = vpop.f32.mrf.mxu1 }
0x143f   :  { %v2466_v45 = vadd.f32 %v3998_v18, %v2465_v0  ;;  %v2636_v56 = vpop.f32.mrf.mxu2 }
0x1440   :  { %v2706_v25 = vpop.f32.mrf.mxu3 }
0x1441   :  { %v2567_v44 = vadd.f32 %v2566_v30, %v2466_v45 }
0x1443   :  { %v2637_v49 = vadd.f32 %v2636_v56, %v2567_v44 }
0x1445   :  { %v2707_v20 = vadd.f32 %v2706_v25, %v2637_v49 }
0x1446   :  { %v2473_v15 = vpop.f32.mrf.mxu0  ;;  %v3993_v10 = vpop.f32.mrf.mxu1 }
0x1447   :  { %v2474_v27 = vadd.f32 %v3998_v18, %v2473_v15  ;;  %v2641_v33 = vpop.f32.mrf.mxu2 }
0x1448   :  { %v2712_v61 = vpop.f32.mrf.mxu3 }
0x1449   :  { %v2571_v36 = vadd.f32 %v2570_v60, %v2474_v27 }
0x144b   :  { %v2642_v16 = vadd.f32 %v2641_v33, %v2571_v36 }
0x144d   :  { %v2713_v15 = vadd.f32 %v2712_v61, %v2642_v16 }
0x144e   :  { %v2481_v59 = vpop.f32.mrf.mxu0  ;;  %v4000_v40 = vpop.f32.mrf.mxu1 }
0x144f   :  { %v2482_v22 = vadd.f32 %v3998_v18, %v2481_v59  ;;  %v2646_v52 = vpop.f32.mrf.mxu2 }
0x1450   :  { %v2718_v6 = vpop.f32.mrf.mxu3 }
0x1451   :  { %v2575_v19 = vadd.f32 %v3993_v10, %v2482_v22 }
0x1453   :  { %v2647_v60 = vadd.f32 %v2646_v52, %v2575_v19 }
0x1455   :  { %v2719_v59 = vadd.f32 %v2718_v6, %v2647_v60 }
0x1456   :  { %v4003_v21 = vpop.f32.mrf.mxu0  ;;  %v2826_v62 = vpop.f32.mrf.mxu1 }
0x1457   :  { %v2490_v5 = vadd.f32 %v3998_v18, %v4003_v21  ;;  %v2651_v3 = vpop.f32.mrf.mxu2 }
0x1458   :  { %v2724_v18 = vpop.f32.mrf.mxu3 }
0x1459   :  { %v2579_v7 = vadd.f32 %v4000_v40, %v2490_v5 }
0x145b   :  { %v2652_v12 = vadd.f32 %v2651_v3, %v2579_v7 }
0x145d   :  { %v2725_v21 = vadd.f32 %v2724_v18, %v2652_v12 }
0x145e   :  { %v2769_v35 = vpop.f32.mrf.mxu0  ;;  %v2830_v38 = vpop.f32.mrf.mxu1 }
0x145f   :  { %v2770_v34 = vadd.f32 %v2769_v35, %v2683_v28 }
0x1461   :  { %v2827_v50 = vadd.f32 %v2826_v62, %v2770_v34 }
0x1463   :  { %2857 = vst.msk [vmem:[%s4052_s5] sm:$0xff] %vm521_vm2, %v2827_v50 }
0x1466   :  { %v2773_v31 = vpop.f32.mrf.mxu0  ;;  %v2834_v8 = vpop.f32.mrf.mxu1 }
0x1467   :  { %v2774_v14 = vadd.f32 %v2773_v31, %v2689_v17 }
0x1469   :  { %v2831_v54 = vadd.f32 %v2830_v38, %v2774_v14 }
0x146b   :  { %2858 = vst.msk [vmem:[%s4052_s5 + $0x8] sm:$0xff] %vm521_vm2, %v2831_v54 }
0x146e   :  { %v2777_v24 = vpop.f32.mrf.mxu0  ;;  %v2838_v57 = vpop.f32.mrf.mxu1 }
0x146f   :  { %v2778_v41 = vadd.f32 %v2777_v24, %v2695_v63 }
0x1471   :  { %v2835_v43 = vadd.f32 %v2834_v8, %v2778_v41 }
0x1473   :  { %2859 = vst.msk [vmem:[%s4052_s5 + $0x10] sm:$0xff] %vm521_vm2, %v2835_v43 }
0x1476   :  { %v2781_v2 = vpop.f32.mrf.mxu0  ;;  %v2842_v11 = vpop.f32.mrf.mxu1 }
0x1477   :  { %v2782_v4 = vadd.f32 %v2781_v2, %v2701_v39 }
0x1479   :  { %v2839_v47 = vadd.f32 %v2838_v57, %v2782_v4 }
0x147b   :  { %2860 = vst.msk [vmem:[%s4052_s5 + $0x18] sm:$0xff] %vm521_vm2, %v2839_v47 }
0x147e   :  { %v2785_v13 = vpop.f32.mrf.mxu0  ;;  %v2846_v0 = vpop.f32.mrf.mxu1 }
0x147f   :  { %v2786_v26 = vadd.f32 %v2785_v13, %v2707_v20 }
0x1481   :  { %v2843_v30 = vadd.f32 %v2842_v11, %v2786_v26 }
0x1483   :  { %2861 = vst.msk [vmem:[%s4052_s5 + $0x20] sm:$0xff] %vm521_vm2, %v2843_v30 }
0x1486   :  { %v2789_v23 = vpop.f32.mrf.mxu0  ;;  %v2850_v46 = vpop.f32.mrf.mxu1 }
0x1487   :  { %v2790_v51 = vadd.f32 %v2789_v23, %v2713_v15 }
0x1489   :  { %v2847_v62 = vadd.f32 %v2846_v0, %v2790_v51 }
0x148b   :  { %2862 = vst.msk [vmem:[%s4052_s5 + $0x28] sm:$0xff] %vm521_vm2, %v2847_v62 }
0x148e   :  { %v2793_v28 = vpop.f32.mrf.mxu0  ;;  %v2854_v32 = vpop.f32.mrf.mxu1 }
0x148f   :  { %v2794_v10 = vadd.f32 %v2793_v28, %v2719_v59 }
0x1491   :  { %v2851_v35 = vadd.f32 %v2850_v46, %v2794_v10 }
0x1493   :  { %2863 = vst.msk [vmem:[%s4052_s5 + $0x30] sm:$0xff] %vm521_vm2, %v2851_v35 }
0x1496   :  { %v2797_v38 = vpop.f32.mrf.mxu0 }
0x1497   :  { %v2798_v34 = vadd.f32 %v2797_v38, %v2725_v21 }
0x1499   :  { %v2855_v42 = vadd.f32 %v2854_v32, %v2798_v34 }
0x149b   :  { %2864 = vst.msk [vmem:[%s4052_s5 + $0x38] sm:$0xff] %vm521_vm2, %v2855_v42 }

</bundles_post_ra>
